<compile_context>
chip_gen: v7x
topology: tpu7x:2x2x1
jax: 0.10.0
libtpu: 0.0.40
codegen_flags: <defaults>
</compile_context>

<pallas_src>
import math
from functools import partial

import jax
import jax.numpy as jnp
from jax import lax
from jax.experimental import pallas as pl
from jax.experimental.pallas import tpu as pltpu


def dwconv_bn_kernel(x_ref, dww_ref, pww_ref, bias_ref, mask_ref, o_ref, *, H, W, K):
    # x_ref:    (1, C, H*W)  one batch element; C on sublanes, flat spatial on lanes
    # dww_ref:  (C, K*K)     depthwise weights (per-channel), f32
    # pww_ref:  (C, C)       pointwise weights (Cout, Cin), BN scale folded in, bf16
    # bias_ref: (C, 1)       folded BatchNorm bias, f32
    # mask_ref: (2, H*W)     0/1 validity masks for the dj=-1 / dj=+1 column taps
    # o_ref:    (1, C, H*W)
    C = x_ref.shape[1]
    HW = H * W
    pad = (K - 1) // 2

    x = x_ref[0].astype(jnp.float32)                       # (C, HW)
    dw = dww_ref[...].astype(jnp.float32)                  # (C, K*K)

    if pad > 0:
        # Zero-extend the flat row buffer by (pad*W + pad) on both sides: this
        # gives correct zeros for all out-of-image *row* reads; only the
        # column-wrap positions need masking.
        padw = pad * W + pad
        z = jnp.zeros((C, padw), jnp.float32)
        xz = jnp.concatenate([z, x, z], axis=1)            # (C, HW + 2*padw)
        lmask = mask_ref[0:1, :]                           # valid where w >= 1
        rmask = mask_ref[1:2, :]                           # valid where w <= W-2
    else:
        padw = 0
        xz = x

    # Depthwise conv: K*K lane-shifted views, each a per-channel FMA on the VPU.
    acc = None
    for ki in range(K):
        for kj in range(K):
            di, dj = ki - pad, kj - pad
            off = di * W + dj
            tap = xz[:, padw + off: padw + off + HW]       # (C, HW)
            if dj < 0:
                tap = tap * lmask
            elif dj > 0:
                tap = tap * rmask
            t = ki * K + kj
            contrib = tap * dw[:, t:t + 1]                 # (C,1) bcast over lanes
            acc = contrib if acc is None else acc + contrib

    # Pointwise 1x1 conv on the MXU: bf16 inputs, f32 accumulation.
    # (Cout, Cin) @ (Cin, HW) -> (Cout, HW): output stays channels-major.
    y = jnp.dot(pww_ref[...], acc.astype(jnp.bfloat16),
                preferred_element_type=jnp.float32)        # (C, HW) f32

    y = y + bias_ref[...]                                  # folded BN bias
    y = y * jnp.clip(y + 3.0, 0.0, 6.0) * (1.0 / 6.0)      # Hardswish
    o_ref[0] = y.astype(o_ref.dtype)


def _vmem_limit_bytes():
    """Capacity-aware scoped-VMEM raise (v5e/v6e: 96 MiB; v7x: ~48 MiB)."""
    try:
        cap = int(pltpu.get_tpu_info().vmem_capacity_bytes)
        return min(3 * cap // 4, 96 * 1024 * 1024)
    except Exception:
        return None


def dwconv2d_bn(x_nchw, dw_w, pw_w, bn_gamma, bn_beta, bn_mean, bn_var,
                *, eps=1e-5, kernel_size=3):
    # TODO(synk): stride > 1 and in_ch != out_ch are not implemented (the MPViT
    # usage exercised here is stride=1 with equal in/out channels).
    # TODO(synk): for production image sizes (e.g. 224x224) add a spatial tile
    # axis to the grid (with a row halo) so per-step blocks stay inside v7x's
    # 64 MiB VMEM and the megacore gets more parallel steps.
    B, C, H, W = x_nchw.shape
    K = kernel_size
    assert K in (1, 3), "kernel supports kernel_size in {1, 3}"
    assert dw_w.shape == (C, 1, K, K) and pw_w.shape == (C, C, 1, 1)
    HW = H * W

    # Free contiguous reshape: NCHW -> (B, C, H*W).  No transpose / pad passes.
    x_flat = x_nchw.reshape(B, C, HW)

    # Depthwise weights (C, 1, K, K) -> (C, K*K): channels on sublanes.
    dww = dw_w[:, 0, :, :].reshape(C, K * K)

    # Fold eval-mode BatchNorm: scale into pointwise weights, bias added in-kernel.
    inv_std = 1.0 / jnp.sqrt(bn_var + eps)
    scale = bn_gamma * inv_std
    bias = (bn_beta - bn_mean * scale).reshape(C, 1).astype(jnp.float32)
    pww = (pw_w[:, :, 0, 0] * scale[:, None]).astype(jnp.bfloat16)       # (Cout, Cin)

    # 0/1 masks for the column taps that would wrap across rows in flat layout.
    col = jnp.arange(HW, dtype=jnp.int32) % W
    masks = jnp.stack([(col >= 1), (col <= W - 2)]).astype(jnp.float32)  # (2, HW)

    flops = 2 * B * HW * C * C + 2 * B * HW * C * K * K
    bytes_accessed = (2 * B * C * HW) * 4 + dww.size * 4 + pww.size * 2 \
        + bias.size * 4 + masks.size * 4

    cp_kwargs = dict(dimension_semantics=("parallel",))
    vl = _vmem_limit_bytes()
    if vl is not None:
        cp_kwargs["vmem_limit_bytes"] = vl

    kernel = partial(dwconv_bn_kernel, H=H, W=W, K=K)
    out_flat = pl.pallas_call(
        kernel,
        out_shape=jax.ShapeDtypeStruct((B, C, HW), x_nchw.dtype),
        grid=(B,),
        in_specs=[
            pl.BlockSpec((1, C, HW), lambda b: (b, 0, 0)),
            pl.BlockSpec((C, K * K), lambda b: (0, 0)),
            pl.BlockSpec((C, C), lambda b: (0, 0)),
            pl.BlockSpec((C, 1), lambda b: (0, 0)),
            pl.BlockSpec((2, HW), lambda b: (0, 0)),
        ],
        out_specs=pl.BlockSpec((1, C, HW), lambda b: (b, 0, 0)),
        compiler_params=pltpu.CompilerParams(**cp_kwargs),
        cost_estimate=pl.CostEstimate(flops=flops, transcendentals=0,
                                      bytes_accessed=bytes_accessed),
    )(x_flat, dww, pww, bias, masks)

    return out_flat.reshape(B, C, H, W)


def reference_forward(x_nchw, dw_w, pw_w, bn_gamma, bn_beta, bn_mean, bn_var,
                      *, eps=1e-5, kernel_size=3):
    """Plain-JAX f32 reference matching the PyTorch forward (eval-mode BN)."""
    C = x_nchw.shape[1]
    pad = (kernel_size - 1) // 2
    dn = ("NCHW", "OIHW", "NCHW")
    y = lax.conv_general_dilated(
        x_nchw, dw_w, window_strides=(1, 1), padding=[(pad, pad), (pad, pad)],
        dimension_numbers=dn, feature_group_count=C)
    y = lax.conv_general_dilated(
        y, pw_w, window_strides=(1, 1), padding=[(0, 0), (0, 0)],
        dimension_numbers=dn)
    inv_std = 1.0 / jnp.sqrt(bn_var + eps)
    y = (y - bn_mean[None, :, None, None]) * (bn_gamma * inv_std)[None, :, None, None] \
        + bn_beta[None, :, None, None]
    return y * jnp.clip(y + 3.0, 0.0, 6.0) / 6.0


if __name__ == "__main__":
    B, C, H, W = 2, 64, 16, 16   # in_ch == out_ch == C (groups=out_ch depthwise)
    K = 3

    key = jax.random.PRNGKey(0)
    k_x, k_dw, k_pw = jax.random.split(key, 3)

    x = jax.random.normal(k_x, (B, C, H, W), dtype=jnp.float32)

    # Conv2d init: normal(0, sqrt(2/n)), n = kH*kW*out_channels
    dw_std = math.sqrt(2.0 / (K * K * C))
    pw_std = math.sqrt(2.0 / (1 * 1 * C))
    dw_w = dw_std * jax.random.normal(k_dw, (C, 1, K, K), dtype=jnp.float32)
    pw_w = pw_std * jax.random.normal(k_pw, (C, C, 1, 1), dtype=jnp.float32)

    # BatchNorm2d init: weight=bn_weight_init=1, bias=0, running stats (0, 1)
    bn_gamma = jnp.ones((C,), jnp.float32)
    bn_beta = jnp.zeros((C,), jnp.float32)
    bn_mean = jnp.zeros((C,), jnp.float32)
    bn_var = jnp.ones((C,), jnp.float32)

    out = dwconv2d_bn(x, dw_w, pw_w, bn_gamma, bn_beta, bn_mean, bn_var,
                      kernel_size=K)
    out = jax.block_until_ready(out)

    ref = reference_forward(x, dw_w, pw_w, bn_gamma, bn_beta, bn_mean, bn_var,
                            kernel_size=K)
    assert out.shape == (B, C, H, W)
    # Pointwise matmul uses bf16 MXU inputs (f32 accumulation), so compare
    # against the f32 reference with a correspondingly loosened tolerance.
    assert jnp.allclose(out, ref, atol=3e-2, rtol=3e-2), "mismatch vs reference"

    print("KERNEL_OK")
</pallas_src>

<mosaic_0001>
module attributes {stable_mosaic.version = 11 : i64} {
  func.func @dwconv_bn_kernel(%arg0: i32, %arg1: memref<1x64x256xf32, #tpu.memory_space<vmem>>, %arg2: memref<64x9xf32, #tpu.memory_space<vmem>>, %arg3: memref<64x64xbf16, #tpu.memory_space<vmem>>, %arg4: memref<64x1xf32, #tpu.memory_space<vmem>>, %arg5: memref<2x256xf32, #tpu.memory_space<vmem>>, %arg6: memref<1x64x256xf32, #tpu.memory_space<vmem>>) attributes {dimension_semantics = [#tpu.dimension_semantics<parallel>], iteration_bounds = array<i64: 2>, scalar_prefetch = 0 : i64, scratch_operands = 0 : i64, tpu.core_type = #tpu.core_type<tc>, window_params = [{transform_indices = @transform_0, window_bounds = array<i64: 1, 64, 256>}, {pipeline_mode = #tpu.pipeline_mode<synchronous>, transform_indices = @transform_1, window_bounds = array<i64: 64, 9>}, {pipeline_mode = #tpu.pipeline_mode<synchronous>, transform_indices = @transform_2, window_bounds = array<i64: 64, 64>}, {pipeline_mode = #tpu.pipeline_mode<synchronous>, transform_indices = @transform_3, window_bounds = array<i64: 64, 1>}, {pipeline_mode = #tpu.pipeline_mode<synchronous>, transform_indices = @transform_4, window_bounds = array<i64: 2, 256>}, {transform_indices = @transform_5, window_bounds = array<i64: 1, 64, 256>}]} {
    %c0 = arith.constant 0 : index
    %c0_0 = arith.constant 0 : index
    %c0_1 = arith.constant 0 : index
    %0 = vector.load %arg1[%c0, %c0_0, %c0_1] : memref<1x64x256xf32, #tpu.memory_space<vmem>>, vector<1x64x256xf32>
    %1 = vector.shape_cast %0 : vector<1x64x256xf32> to vector<64x256xf32>
    %c0_2 = arith.constant 0 : index
    %c0_3 = arith.constant 0 : index
    %2 = vector.load %arg2[%c0_2, %c0_3] : memref<64x9xf32, #tpu.memory_space<vmem>>, vector<64x9xf32>
    %cst = arith.constant 0.000000e+00 : f32
    %3 = vector.broadcast %cst : f32 to vector<64x17xf32>
    %4 = tpu.concatenate %3, %1, %3 in 1 : vector<64x17xf32>, vector<64x256xf32>, vector<64x17xf32> -> vector<64x290xf32>
    %c0_4 = arith.constant 0 : index
    %c0_5 = arith.constant 0 : index
    %5 = vector.load %arg5[%c0_4, %c0_5] : memref<2x256xf32, #tpu.memory_space<vmem>>, vector<1x256xf32>
    %c1 = arith.constant 1 : index
    %c0_6 = arith.constant 0 : index
    %6 = vector.load %arg5[%c1, %c0_6] : memref<2x256xf32, #tpu.memory_space<vmem>>, vector<1x256xf32>
    %7 = vector.extract_strided_slice %4 {offsets = [0, 0], sizes = [64, 256], strides = [1, 1]} : vector<64x290xf32> to vector<64x256xf32>
    %8 = vector.broadcast %5 : vector<1x256xf32> to vector<64x256xf32>
    %9 = arith.mulf %7, %8 : vector<64x256xf32>
    %10 = vector.extract_strided_slice %2 {offsets = [0, 0], sizes = [64, 1], strides = [1, 1]} : vector<64x9xf32> to vector<64x1xf32>
    %11 = vector.broadcast %10 : vector<64x1xf32> to vector<64x256xf32>
    %12 = arith.mulf %9, %11 : vector<64x256xf32>
    %13 = vector.extract_strided_slice %4 {offsets = [0, 1], sizes = [64, 256], strides = [1, 1]} : vector<64x290xf32> to vector<64x256xf32>
    %14 = vector.extract_strided_slice %2 {offsets = [0, 1], sizes = [64, 1], strides = [1, 1]} : vector<64x9xf32> to vector<64x1xf32>
    %15 = vector.broadcast %14 : vector<64x1xf32> to vector<64x256xf32>
    %16 = arith.mulf %13, %15 : vector<64x256xf32>
    %17 = arith.addf %12, %16 : vector<64x256xf32>
    %18 = vector.extract_strided_slice %4 {offsets = [0, 2], sizes = [64, 256], strides = [1, 1]} : vector<64x290xf32> to vector<64x256xf32>
    %19 = vector.broadcast %6 : vector<1x256xf32> to vector<64x256xf32>
    %20 = arith.mulf %18, %19 : vector<64x256xf32>
    %21 = vector.extract_strided_slice %2 {offsets = [0, 2], sizes = [64, 1], strides = [1, 1]} : vector<64x9xf32> to vector<64x1xf32>
    %22 = vector.broadcast %21 : vector<64x1xf32> to vector<64x256xf32>
    %23 = arith.mulf %20, %22 : vector<64x256xf32>
    %24 = arith.addf %17, %23 : vector<64x256xf32>
    %25 = vector.extract_strided_slice %4 {offsets = [0, 16], sizes = [64, 256], strides = [1, 1]} : vector<64x290xf32> to vector<64x256xf32>
    %26 = vector.broadcast %5 : vector<1x256xf32> to vector<64x256xf32>
    %27 = arith.mulf %25, %26 : vector<64x256xf32>
    %28 = vector.extract_strided_slice %2 {offsets = [0, 3], sizes = [64, 1], strides = [1, 1]} : vector<64x9xf32> to vector<64x1xf32>
    %29 = vector.broadcast %28 : vector<64x1xf32> to vector<64x256xf32>
    %30 = arith.mulf %27, %29 : vector<64x256xf32>
    %31 = arith.addf %24, %30 : vector<64x256xf32>
    %32 = vector.extract_strided_slice %4 {offsets = [0, 17], sizes = [64, 256], strides = [1, 1]} : vector<64x290xf32> to vector<64x256xf32>
    %33 = vector.extract_strided_slice %2 {offsets = [0, 4], sizes = [64, 1], strides = [1, 1]} : vector<64x9xf32> to vector<64x1xf32>
    %34 = vector.broadcast %33 : vector<64x1xf32> to vector<64x256xf32>
    %35 = arith.mulf %32, %34 : vector<64x256xf32>
    %36 = arith.addf %31, %35 : vector<64x256xf32>
    %37 = vector.extract_strided_slice %4 {offsets = [0, 18], sizes = [64, 256], strides = [1, 1]} : vector<64x290xf32> to vector<64x256xf32>
    %38 = vector.broadcast %6 : vector<1x256xf32> to vector<64x256xf32>
    %39 = arith.mulf %37, %38 : vector<64x256xf32>
    %40 = vector.extract_strided_slice %2 {offsets = [0, 5], sizes = [64, 1], strides = [1, 1]} : vector<64x9xf32> to vector<64x1xf32>
    %41 = vector.broadcast %40 : vector<64x1xf32> to vector<64x256xf32>
    %42 = arith.mulf %39, %41 : vector<64x256xf32>
    %43 = arith.addf %36, %42 : vector<64x256xf32>
    %44 = vector.extract_strided_slice %4 {offsets = [0, 32], sizes = [64, 256], strides = [1, 1]} : vector<64x290xf32> to vector<64x256xf32>
    %45 = vector.broadcast %5 : vector<1x256xf32> to vector<64x256xf32>
    %46 = arith.mulf %44, %45 : vector<64x256xf32>
    %47 = vector.extract_strided_slice %2 {offsets = [0, 6], sizes = [64, 1], strides = [1, 1]} : vector<64x9xf32> to vector<64x1xf32>
    %48 = vector.broadcast %47 : vector<64x1xf32> to vector<64x256xf32>
    %49 = arith.mulf %46, %48 : vector<64x256xf32>
    %50 = arith.addf %43, %49 : vector<64x256xf32>
    %51 = vector.extract_strided_slice %4 {offsets = [0, 33], sizes = [64, 256], strides = [1, 1]} : vector<64x290xf32> to vector<64x256xf32>
    %52 = vector.extract_strided_slice %2 {offsets = [0, 7], sizes = [64, 1], strides = [1, 1]} : vector<64x9xf32> to vector<64x1xf32>
    %53 = vector.broadcast %52 : vector<64x1xf32> to vector<64x256xf32>
    %54 = arith.mulf %51, %53 : vector<64x256xf32>
    %55 = arith.addf %50, %54 : vector<64x256xf32>
    %56 = vector.extract_strided_slice %4 {offsets = [0, 34], sizes = [64, 256], strides = [1, 1]} : vector<64x290xf32> to vector<64x256xf32>
    %57 = vector.broadcast %6 : vector<1x256xf32> to vector<64x256xf32>
    %58 = arith.mulf %56, %57 : vector<64x256xf32>
    %59 = vector.extract_strided_slice %2 {offsets = [0, 8], sizes = [64, 1], strides = [1, 1]} : vector<64x9xf32> to vector<64x1xf32>
    %60 = vector.broadcast %59 : vector<64x1xf32> to vector<64x256xf32>
    %61 = arith.mulf %58, %60 : vector<64x256xf32>
    %62 = arith.addf %55, %61 : vector<64x256xf32>
    %c0_7 = arith.constant 0 : index
    %c0_8 = arith.constant 0 : index
    %63 = vector.load %arg3[%c0_7, %c0_8] : memref<64x64xbf16, #tpu.memory_space<vmem>>, vector<64x64xbf16>
    %64 = arith.truncf %62 : vector<64x256xf32> to vector<64x256xbf16>
    %cst_9 = arith.constant dense<0.000000e+00> : vector<64x256xf32>
    %65 = tpu.matmul %63, %64, %cst_9 {dimension_numbers = #tpu.dot_dimension_numbers<[1], [0], [0], [1], [0, 0, 1, 1], [], []>} : vector<64x64xbf16>, vector<64x256xbf16>, vector<64x256xf32> -> vector<64x256xf32>
    %c0_10 = arith.constant 0 : index
    %c0_11 = arith.constant 0 : index
    %66 = vector.load %arg4[%c0_10, %c0_11] : memref<64x1xf32, #tpu.memory_space<vmem>>, vector<64x1xf32>
    %67 = vector.broadcast %66 : vector<64x1xf32> to vector<64x256xf32>
    %68 = arith.addf %65, %67 : vector<64x256xf32>
    %cst_12 = arith.constant 3.000000e+00 : f32
    %69 = vector.broadcast %cst_12 : f32 to vector<64x256xf32>
    %70 = arith.addf %68, %69 : vector<64x256xf32>
    %cst_13 = arith.constant 0.000000e+00 : f32
    %cst_14 = arith.constant 6.000000e+00 : f32
    %71 = vector.broadcast %cst_13 : f32 to vector<64x256xf32>
    %72 = arith.maximumf %71, %70 : vector<64x256xf32>
    %73 = vector.broadcast %cst_14 : f32 to vector<64x256xf32>
    %74 = arith.minimumf %73, %72 : vector<64x256xf32>
    %75 = arith.mulf %68, %74 : vector<64x256xf32>
    %cst_15 = arith.constant 0.166666672 : f32
    %76 = vector.broadcast %cst_15 : f32 to vector<64x256xf32>
    %77 = arith.mulf %75, %76 : vector<64x256xf32>
    %c0_16 = arith.constant 0 : index
    %c0_17 = arith.constant 0 : index
    %c0_18 = arith.constant 0 : index
    %78 = vector.load %arg6[%c0_16, %c0_17, %c0_18] : memref<1x64x256xf32, #tpu.memory_space<vmem>>, vector<1x64x256xf32>
    %79 = vector.shape_cast %78 : vector<1x64x256xf32> to vector<64x256xf32>
    %80 = vector.shape_cast %77 : vector<64x256xf32> to vector<1x64x256xf32>
    tpu.vector_store %arg6[%c0_16, %c0_17, %c0_18], %80 {strides = array<i32>} : memref<1x64x256xf32, #tpu.memory_space<vmem>>, vector<1x64x256xf32>,
    return
  }
  func.func @transform_0(%arg0: i32) -> (i32, i32, i32) {
    %c0_i32 = arith.constant 0 : i32
    %c0_i32_0 = arith.constant 0 : i32
    %c0_i32_1 = arith.constant 0 : i32
    return %arg0, %c0_i32, %c0_i32_0 : i32, i32, i32
  }
  func.func @transform_1(%arg0: i32) -> (i32, i32) {
    %c0_i32 = arith.constant 0 : i32
    %c0_i32_0 = arith.constant 0 : i32
    %c0_i32_1 = arith.constant 0 : i32
    return %c0_i32, %c0_i32_0 : i32, i32
  }
  func.func @transform_2(%arg0: i32) -> (i32, i32) {
    %c0_i32 = arith.constant 0 : i32
    %c0_i32_0 = arith.constant 0 : i32
    %c0_i32_1 = arith.constant 0 : i32
    return %c0_i32, %c0_i32_0 : i32, i32
  }
  func.func @transform_3(%arg0: i32) -> (i32, i32) {
    %c0_i32 = arith.constant 0 : i32
    %c0_i32_0 = arith.constant 0 : i32
    %c0_i32_1 = arith.constant 0 : i32
    return %c0_i32, %c0_i32_0 : i32, i32
  }
  func.func @transform_4(%arg0: i32) -> (i32, i32) {
    %c0_i32 = arith.constant 0 : i32
    %c0_i32_0 = arith.constant 0 : i32
    %c0_i32_1 = arith.constant 0 : i32
    return %c0_i32, %c0_i32_0 : i32, i32
  }
  func.func @transform_5(%arg0: i32) -> (i32, i32, i32) {
    %c0_i32 = arith.constant 0 : i32
    %c0_i32_0 = arith.constant 0 : i32
    %c0_i32_1 = arith.constant 0 : i32
    return %arg0, %c0_i32, %c0_i32_0 : i32, i32, i32
  }
}

</mosaic_0001>

<bundles_post_ra>
// kernel: tpu_custom_call.1
= control target key start
LH: loop header
LB: loop body
LE: loop exit
PB: predicated region body
PF: predicated region fallthrough
CT: control target
= control target key end

     0   :  { %10 = vsyncpa [#allocation3], 0  ;;  %s4557_s0 = inlined_call_operand.hbm [shape: f32[2,64,256], index: 0, kind: input, shape index: {}]   ;;  %s4558_s1 = inlined_call_operand.vmem [shape: f32[64,9], index: 1, kind: input, shape index: {}]   ;;  %s4559_s2 = inlined_call_operand.vmem [shape: bf16[64,64], index: 2, kind: input, shape index: {}]   ;;  %s4560_s3 = inlined_call_operand.vmem [shape: f32[64,1], index: 3, kind: input, shape index: {}]   ;;  %s4561_s4 = inlined_call_operand.vmem [shape: f32[2,256], index: 4, kind: input, shape index: {}]   ;;  %s4562_s5 = inlined_call_operand.hbm [shape: f32[2,64,256], index: 5, kind: output, shape index: {}]  }
   0x1   :  { %12 = vsyncpa [#allocation3 + $0x1], 0 }
   0x2   :  { %13 = vsyncpa [#allocation4], 0 }
   0x3   :  { %15 = vsyncpa [#allocation4 + $0x1], 0  ;;  %s2698_s18 = smov 0   ;;  %s2700_s19 = smov 0  }
   0x4   :  { %s2702_s20 = smov 0   ;;  %s2704_s21 = smov 0  }
   0x5 LB: > { %s2719_s22 = sadd.s32 4294967295, %s2638_s21   ;;  %s2394_s23 = sadd.s32 4294967294, %s2638_s21   ;;  %s2638_s21 = sphi %s2704_s21, %s4854_s21   ;;  %s2634_s20 = sphi %s2702_s20, %s4853_s20   ;;  %s2630_s19 = sphi %s2700_s19, %s4852_s19   ;;  %s2626_s18 = sphi %s2698_s18, %s4851_s18  }
   0x6   : > { %s2723_s24 = sadd.s32 1, %s2638_s21   ;;  %s28_s25 = sadd.s32 1, %s2634_s20 }
   0x7   : > { %s25_s26 = ssub.s32 %s2638_s21, %s2723_s24  ;;  %p35_p0 = scmp.ne.s32.totalorder %s2634_s20, %s2630_s19 }
   0x8   : > { %p26_p1 = scmp.eq.s32.totalorder %s25_s26, 0  ;;  %p36_p2 = scmp.eq.s32.totalorder %s2638_s21, 0 }
   0x9   : > { %p41_p3 = scmp.ne.s32.totalorder %s2630_s19, %s2626_s18  ;;  %p42_p4 = scmp.eq.s32.totalorder %s2719_s22, 0 }
   0xa   : > { %s2735_s27 = scalar_select %p26_p1, %s2634_s20, %s28_s25  }
   0xb   : > { %p2737_p5 = por %p36_p2, %p35_p0  ;;  %p2741_p6 = por %p42_p4, %p41_p3 }
   0xc   : > { %p149_p7 = scmp.eq.s32.totalorder %s2719_s22, 1  ;;  %p155_p8 = scmp.eq.s32.totalorder %s2394_s23, 1 }
   0xd   : > { %p2439_p10 = scmp.lt.s32.totalorder %s2638_s21, 2  ;;  %s187_s7 = sand.u32 1, %s2634_s20  }
   0xe   : > { %p2748_p11 = por %p149_p7, %p35_p0  ;;  %p2752_p12 = por %p155_p8, %p41_p3 }
   0xf   : > { %s2417_s8 = sshll.u32 %s2638_s21, 11  ;;  %s2397_s9 = sshll.u32 %s187_s7, 7 }
  0x10   : > { %s4637_s30 = scalar_select %p2748_p11, 1, 0 }
  0x11   : > { %s4638_s6 = scalar_select %p2752_p12, 1, 0 }
  0x12   : > { %s2761_s12 = scalar_lea.hbm %s4557_s0, %s2417_s8  ;;  %s191_s13 = scalar_lea.vmem [#allocation2], %s2397_s9 }
  0x13   : > { %s198_s14 = sshll.u32 %s191_s13, 4  ;;  %p2765_p13 = pnand %p2439_p10, %p2737_p5  ;;  %s2769_s14 = int_to_ptr.vmem [resolvable:$true] %s198_s14 }
  0x14   : > { %s2771_s16 = scalar_lea.sflag [#allocation3], %s187_s7  ;;  %s2542_s17 = scalar_lea.hbm %s2761_s12, 2048 }
  0x15   : > { %p2543_p0 = scmp.ne.s32.totalorder %s2761_s12, %s2542_s17  ;;  %p2544_p1 = pneg %p2765_p13 }
  0x16   : > { %s2547_s26 = scalar_lea.hbm %s4557_s0, 4096  ;;  %p2548_p4 = scmp.lt.u32.totalorder %s2761_s12, %s4557_s0 }
  0x17   : > { %p2545_p2 = pnand %p2544_p1, %p2543_p0  ;;  %p2549_p5 = scmp.lt.u32.totalorder %s2547_s26, %s2542_s17 }
  0x18   : > { %p2551_p8 = scmp.lt.u32.totalorder %s2542_s17, %s2761_s12 }
  0x19   : > { %p2546_p3 = pneg %p2545_p2  ;;  %p2550_p7 = por %p2549_p5, %p2548_p4 }
  0x1b   : > { %p2552_p10 = por %p2551_p8, %p2550_p7 }
  0x1d   : > { %p2553_p9 = pnand %p2552_p10, %p2546_p3 }
  0x1f   : > { %2556 = shalt.err (!%p2553_p9)
}
  0x20   : > { %s2557_s7 = scalar_lea.vmem %s2769_s14, 2048  ;;  %s2640_s9 = smov [#allocation2]  }
  0x21   : > { %p2558_p0 = scmp.ne.s32.totalorder %s2769_s14, %s2557_s7  ;;  %s2562_s10 = sshll.u32 %s2640_s9, 4  ;;  %s2563_s10 = int_to_ptr.vmem [resolvable:$false] %s2562_s10 }
  0x22   : > { %s2564_s11 = scalar_lea.vmem %s2563_s10, 4096  ;;  %p2565_p11 = scmp.lt.s32.totalorder %s2769_s14, %s2563_s10 }
  0x23   : > { %p2560_p2 = pnand %p2558_p0, %p2544_p1  ;;  %p2566_p4 = scmp.lt.s32.totalorder %s2564_s11, %s2557_s7 }
  0x25   : > { %p2561_p12 = pneg %p2560_p2  ;;  %p2567_p5 = por %p2566_p4, %p2565_p11 }
  0x27   : > { %p2568_p7 = pnand %p2567_p5, %p2561_p12 }
  0x29   : > { %2571 = shalt.err (!%p2568_p7)
}
  0x2a   : > { %s2641_s13 = smov 256   ;;  %s2642_s17 = smov 16  }
  0x2b   : > { %2434 = dma.hbm_to_vmem [thread:$0]  (!%p2765_p13), %s2761_s12, 2048, %s2769_s14, %s2771_s16, %s2641_s13, %s2641_s13, %s2642_s17  }
  0x2c   : > { %p2400_p9 = scmp.ge.s32.totalorder %s2638_s21, 1  ;;  %p206_p1 = scmp.lt.s32.totalorder %s2638_s21, 3 }
  0x2e   : > { %p207_p3 = pnand %p2400_p9, %p206_p1 }
  0x30   : > { %210 = sbr.rel (%p207_p3) target bundleno = 1409 (0x581), region = 40 }
  0x37   : > { %s2802_s23 = sand.u32 1, %s2630_s19  }
  0x38   : > { %s2401_s25 = sshll.u32 %s2802_s23, 7  ;;  %s213_s26 = scalar_lea.sflag [#allocation3], %s2802_s23 }
  0x39   : > { %s2808_s28 = scalar_lea.vmem [#allocation2], %s2401_s25 }
  0x3a   : > { %2617 = dma.done.wait (%p2741_p6), %s213_s26, 2048  }
  0x3b   : > { %2619 = vsyncadd (%p2741_p6), %s213_s26, 4294965248  ;;  %v2643_v0 = vmov 1   ;;  %v4564_v1 = vmov 0   ;;  %v246_v2 = vld [vmem:[%s2808_s28 + $0x10] sm:$0xff]  ;;  %v244_v3 = vld [vmem:[%s2808_s28] sm:$0xff]  ;;  %s2645_s29 = smov 17   ;;  %v369_v18 = vlaneseq }
  0x3c   : > { %2501 = vset.pattern.permute.xlu0 %v2643_v0  ;;  %2499 = vset.pattern.permute.xlu1 %v4564_v1  ;;  %v247_v4 = vld [vmem:[%s2808_s28 + $0x18] sm:$0xff]  ;;  %v245_v5 = vld [vmem:[%s2808_s28 + $0x8] sm:$0xff]  ;;  %v248_v7 = vld [vmem:[%s2808_s28 + $0x20] sm:$0xff]  ;;  %s2646_s17 = smov 2   ;;  %v2647_v27 = vmov 2   ;;  %v2648_v43 = vmov 3  }
  0x3d   : > { %2170 = vmatprep.mubr.bf16.mxu0 %v4564_v1  ;;  %2190 = vmatprep.mubr.bf16.mxu1 %v4564_v1  ;;  %v249_v6 = vld [vmem:[%s2808_s28 + $0x28] sm:$0xff]  ;;  %v251_v8 = vld [vmem:[%s2808_s28 + $0x38] sm:$0xff]  ;;  %v250_v9 = vld [vmem:[%s2808_s28 + $0x30] sm:$0xff]  ;;  %v2840_v20 = vshrl.u32 %v369_v18, 7  ;;  %vm316_vm0 = vcmask 138240   ;;  %s2649_s7 = smov 127  }
  0x3e   : > { %288 = vrot.lane.b32.xlu1 %v246_v2, %s2645_s29  ;;  %284 = vrot.lane.b32.xlu0 %v244_v3, %s2645_s29  ;;  %v253_v10 = vld [vmem:[%s2808_s28 + $0x48] sm:$0xff]  ;;  %v252_v11 = vld [vmem:[%s2808_s28 + $0x40] sm:$0xff]  ;;  %vm641_vm1 = vcmask 15360   ;;  %s2650_s9 = smov 126   ;;  %s2651_s13 = smov 16   ;;  %vm579_vm2 = vcmask 1039360  }
  0x3f   : > { %v255_v12 = vld [vmem:[%s2808_s28 + $0x58] sm:$0xff]  ;;  %v254_v13 = vld [vmem:[%s2808_s28 + $0x50] sm:$0xff]  ;;  %v257_v14 = vld [vmem:[%s2808_s28 + $0x68] sm:$0xff]  ;;  %v371_v23 = vsub.s32 0, %v2840_v20  ;;  %v375_v32 = vsub.s32 1, %v2840_v20  ;;  %vm798_vm3 = vcmask 1031168  }
  0x40   : > { %v256_v15 = vld [vmem:[%s2808_s28 + $0x60] sm:$0xff]  ;;  %v259_v16 = vld [vmem:[%s2808_s28 + $0x78] sm:$0xff]  ;;  %v258_v17 = vld [vmem:[%s2808_s28 + $0x70] sm:$0xff]  ;;  %vm851_vm4 = vcmask 130048   ;;  %vm1008_vm5 = vcmask 916480   ;;  %s2656_s26 = smov 111  }
  0x41   : > { %v2836_v19 = vld [vmem:[%s4558_s1 + $0x8] sm:$0xff]  ;;  %v2845_v21 = vld [vmem:[%s4558_s1 + $0x10] sm:$0xff]  ;;  %v2850_v22 = vld [vmem:[%s4558_s1 + $0x20] sm:$0xff]  ;;  %s2657_s28 = smov 18   ;;  %s2660_s12 = smov 34   ;;  %vm1238_vm6 = vcmask 146432  }
  0x42   : > { %290 = vrot.lane.b32.xlu1 %v247_v4, %s2645_s29  ;;  %286 = vrot.lane.b32.xlu0 %v245_v5, %s2645_s29  ;;  %v2858_v24 = vld [vmem:[%s4558_s1 + $0x30] sm:$0xff]  ;;  %v2403_v25 = vld [vmem:[%s4561_s4 + $0x1] ss:$2 sm:$0x3]  ;;  %vm1448_vm7 = vcmask 261120   ;;  %s2664_s10 = smov 95  }
  0x43   : > { %v2867_v26 = vrot.slane %v2403_v25, %v371_v23  ;;  %v2874_v28 = vld [vmem:[%s4558_s1] sm:$0xff]  ;;  %v2881_v29 = vld [vmem:[%s4558_s1 + $0x18] sm:$0xff]  ;;  %v2888_v30 = vld [vmem:[%s4558_s1 + $0x28] sm:$0xff]  ;;  %v2903_v33 = vrot.slane %v2403_v25, %v375_v32  ;;  %vm1835_vm8 = vcmask 277504   ;;  %s2665_s11 = smov 94   ;;  %vm1185_vm9 = vcmask 908288  }
  0x44   : > { %v2895_v31 = vld [vmem:[%s4558_s1 + $0x38] sm:$0xff]  ;;  %vm1395_vm10 = vcmask 900096   ;;  %vm1605_vm11 = vcmask 785408   ;;  %vm1782_vm12 = vcmask 777216   ;;  %vm1992_vm13 = vcmask 769024   ;;  %p4848_p11 = scmp.ne.s32.totalorder %s4637_s30, 0 }
  0x45   : > { %vm2125_vm14 = vcmask 523264   ;;  %s2666_s14 = smov [#allocation5]  }
  0x46   : > { %294 = vrot.lane.b32.xlu1 %v249_v6, %s2645_s29  ;;  %292 = vrot.lane.b32.xlu0 %v248_v7, %s2645_s29  ;;  %s2576_s15 = sshll.u32 %s2666_s14, 4  ;;  %s2577_s15 = int_to_ptr.vmem [resolvable:$false] %s2576_s15 }
  0x47   : > { %s2578_s16 = scalar_lea.vmem %s2577_s15, 4096 }
  0x4a   : > { %298 = vrot.lane.b32.xlu1 %v251_v8, %s2645_s29  ;;  %296 = vrot.lane.b32.xlu0 %v250_v9, %s2645_s29 }
  0x4e   : > { %302 = vrot.lane.b32.xlu1 %v253_v10, %s2645_s29  ;;  %300 = vrot.lane.b32.xlu0 %v252_v11, %s2645_s29 }
  0x52   : > { %306 = vrot.lane.b32.xlu1 %v255_v12, %s2645_s29  ;;  %304 = vrot.lane.b32.xlu0 %v254_v13, %s2645_s29 }
  0x56   : > { %310 = vrot.lane.b32.xlu1 %v257_v14, %s2645_s29  ;;  %308 = vrot.lane.b32.xlu0 %v256_v15, %s2645_s29 }
  0x5a   : > { %314 = vrot.lane.b32.xlu1 %v259_v16, %s2645_s29  ;;  %312 = vrot.lane.b32.xlu0 %v258_v17, %s2645_s29  ;;  %s2659_s29 = smov 32  }
  0x5e   : > { %402 = vperm.xlu1 %2499, %v2836_v19   ;;  %456 = vperm.xlu0 %2501, %v2836_v19  }
  0x62   : > { %407 = vperm.xlu1 %2499, %v2845_v21   ;;  %468 = vperm.xlu0 %2501, %v2850_v22  }
  0x66   : > { %417 = vperm.xlu1 %2499, %v2850_v22   ;;  %476 = vperm.xlu0 %2501, %v2858_v24  }
  0x6a   : > { %427 = vperm.xlu1 %2499, %v2858_v24   ;;  %637 = vrot.lane.b32.xlu0 %v2867_v26, %s2646_s17 }
  0x6b   : > { %2502 = vset.pattern.permute.xlu0 %v2647_v27 }
  0x6e   : > { %2500 = vset.pattern.permute.xlu1 %v2643_v0  ;;  %671 = vperm.xlu0 %2502, %v2874_v28  }
  0x6f   : > { %452 = vperm.xlu1 %2500, %v2874_v28  }
  0x72   : > { %683 = vperm.xlu0 %2502, %v2881_v29  }
  0x73   : > { %460 = vperm.xlu1 %2500, %v2845_v21  }
  0x76   : > { %691 = vperm.xlu0 %2502, %v2888_v30  }
  0x77   : > { %464 = vperm.xlu1 %2500, %v2881_v29  }
  0x7a   : > { %699 = vperm.xlu0 %2502, %v2895_v31  }
  0x7b   : > { %472 = vperm.xlu1 %2500, %v2888_v30  }
  0x7e   : > { %2505 = vset.pattern.permute.xlu0 %v2648_v43 }
  0x7f   : > { %480 = vperm.xlu1 %2500, %v2895_v31  }
  0x83   : > { %639 = vrot.lane.b32.xlu1 %v2903_v33, %s2646_s17  ;;  %s2653_s17 = smov 112  }
  0x84   : > { %2503 = vset.pattern.permute.xlu1 %v2647_v27 }
  0x87   : > { %675 = vperm.xlu1 %2503, %v2836_v19  }
  0x8b   : > { %679 = vperm.xlu1 %2503, %v2845_v21  }
  0x8f   : > { %687 = vperm.xlu1 %2503, %v2850_v22  }
  0x93   : > { %695 = vperm.xlu1 %2503, %v2858_v24  }
  0x97   : > { %2504 = vset.pattern.permute.xlu1 %v2648_v43 }
  0xb0   : > { %v289_v34 = vpop.permute.xlu1 %288  ;;  %v285_v38 = vpop.permute.xlu0 %284 }
  0xb1   : > { %v2933_v55 = vsel %vm316_vm0, 0.0, %v285_v38  ;;  %v2943_v61 = vsel %vm316_vm0, 0.0, %v289_v34 }
  0xb4   : > { %v291_v35 = vpop.permute.xlu1 %290  ;;  %v287_v40 = vpop.permute.xlu0 %286 }
  0xb5   : > { %v2936_v56 = vsel %vm316_vm0, %v285_v38, %v287_v40  ;;  %v2946_v62 = vsel %vm316_vm0, %v287_v40, 0.0  ;;  %v2953_v2 = vsel %vm316_vm0, %v289_v34, %v291_v35  ;;  %v2956_v3 = vsel %vm316_vm0, %v291_v35, 0.0 }
  0xb8   : > { %v295_v36 = vpop.permute.xlu1 %294  ;;  %v293_v42 = vpop.permute.xlu0 %292 }
  0xb9   : > { %v2963_v7 = vsel %vm316_vm0, %v293_v42, %v295_v36  ;;  %v2966_v8 = vsel %vm316_vm0, 0.0, %v293_v42  ;;  %v2973_v12 = vsel %vm316_vm0, %v295_v36, 0.0 }
  0xba   : > { %4642 = vst [vmem:[#allocation10_spill] sm:$0xff] %v2963_v7 }
  0xbc   : > { %v299_v37 = vpop.permute.xlu1 %298  ;;  %v297_v45 = vpop.permute.xlu0 %296 }
  0xbd   : > { %v2976_v13 = vsel %vm316_vm0, 0.0, %v297_v45  ;;  %v2983_v16 = vsel %vm316_vm0, %v299_v37, 0.0  ;;  %v2986_v17 = vsel %vm316_vm0, %v297_v45, %v299_v37 }
  0xbe   : > { %4643 = vst [vmem:[#allocation11_spill] sm:$0xff] %v2986_v17 }
  0xc0   : > { %v2910_v39 = vpop.permute.xlu1 %302  ;;  %v301_v47 = vpop.permute.xlu0 %300 }
  0xc1   : > { %v2994_v34 = vsel %vm316_vm0, %v301_v47, %v2910_v39  ;;  %v2997_v35 = vsel %vm316_vm0, 0.0, %v301_v47  ;;  %v3005_v40 = vsel %vm316_vm0, %v2910_v39, 0.0 }
  0xc4   : > { %v2912_v41 = vpop.permute.xlu1 %306  ;;  %v2920_v49 = vpop.permute.xlu0 %304 }
  0xc5   : > { %v3009_v42 = vsel %vm316_vm0, 0.0, %v2920_v49  ;;  %v3017_v47 = vsel %vm316_vm0, %v2912_v41, 0.0  ;;  %v3022_v39 = vsel %vm316_vm0, %v2920_v49, %v2912_v41 }
  0xc8   : > { %v2914_v44 = vpop.permute.xlu1 %310  ;;  %v2926_v52 = vpop.permute.xlu0 %308 }
  0xcc   : > { %v2916_v46 = vpop.permute.xlu1 %314  ;;  %v2930_v54 = vpop.permute.xlu0 %312 }
  0xdd   : > { %v2918_v48 = vpop.permute.xlu1 %402  ;;  %v457_v60 = vpop.permute.xlu0 %456 }
  0xde   : > { %4640 = vst [vmem:[#allocation8_spill] sm:$0xff] %v2918_v48  ;;  %v486_v0 = vmul.f32 %v457_v60, %v2943_v61  ;;  %v487_v5 = vmul.f32 %v457_v60, %v2953_v2  ;;  %v488_v6 = vmul.f32 %v457_v60, %v2956_v3 }
  0xe1   : > { %v2922_v50 = vpop.permute.xlu1 %407  ;;  %v469_v27 = vpop.permute.xlu0 %468 }
  0xe2   : > { %4641 = vst [vmem:[#allocation9_spill] sm:$0xff] %v2922_v50  ;;  %v496_v36 = vmul.f32 %v469_v27, %v2994_v34  ;;  %v495_v37 = vmul.f32 %v469_v27, %v2997_v35  ;;  %v497_v45 = vmul.f32 %v469_v27, %v3005_v40 }
  0xe5   : > { %v2924_v51 = vpop.permute.xlu1 %417  ;;  %v477_v60 = vpop.permute.xlu0 %476 }
  0xe9   : > { %v2928_v53 = vpop.permute.xlu1 %427 }
  0xee   : > { %v453_v57 = vpop.permute.xlu1 %452 }
  0xef   : > { %v483_v58 = vmul.f32 %v453_v57, %v2933_v55  ;;  %v484_v59 = vmul.f32 %v453_v57, %v2936_v56  ;;  %v485_v63 = vmul.f32 %v453_v57, %v2946_v62 }
  0xf1   : > { %531 = vrot.lane.b32.xlu0 %v483_v58, %s2649_s7  ;;  %533 = vrot.lane.b32.xlu1 %v484_v59, %s2649_s7 }
  0xf2   : > { %v461_v4 = vpop.permute.xlu1 %460 }
  0xf3   : > { %v489_v9 = vmul.f32 %v461_v4, %v2966_v8  ;;  %v490_v10 = vmul.f32 %v461_v4, %v2963_v7  ;;  %v491_v14 = vmul.f32 %v461_v4, %v2973_v12 }
  0xf5   : > { %535 = vrot.lane.b32.xlu0 %v485_v63, %s2649_s7  ;;  %537 = vrot.lane.b32.xlu1 %v486_v0, %s2649_s7  ;;  %v3031_v63 = vsel %vm316_vm0, %v2926_v52, %v2914_v44  ;;  %v3035_v0 = vsel %vm316_vm0, 0.0, %v2926_v52  ;;  %v3051_v52 = vpop.permute.xlu0 %637 }
  0xf6   : > { %v465_v11 = vpop.permute.xlu1 %464  ;;  %4644 = vst [vmem:[#allocation12_spill] sm:$0xff] %v3031_v63  ;;  %4645 = vst [vmem:[#allocation13_spill] sm:$0xff] %v3035_v0  ;;  %v502_v41 = vmul.f32 %v477_v60, %v3031_v63  ;;  %v501_v49 = vmul.f32 %v477_v60, %v3035_v0 }
  0xf7   : > { %v492_v15 = vmul.f32 %v465_v11, %v2976_v13  ;;  %v493_v18 = vmul.f32 %v465_v11, %v2986_v17  ;;  %v494_v25 = vmul.f32 %v465_v11, %v2983_v16 }
  0xf9   : > { %539 = vrot.lane.b32.xlu0 %v487_v5, %s2649_s7  ;;  %541 = vrot.lane.b32.xlu1 %v488_v6, %s2649_s7  ;;  %v3045_v5 = vsel %vm316_vm0, %v2914_v44, 0.0  ;;  %v3049_v6 = vsel %vm316_vm0, 0.0, %v2930_v54  ;;  %v3063_v44 = vsel %vm316_vm0, %v2916_v46, 0.0  ;;  %v672_v27 = vpop.permute.xlu0 %671 }
  0xfa   : > { %v473_v38 = vpop.permute.xlu1 %472  ;;  %4646 = vst [vmem:[#allocation14_spill] sm:$0xff] %v3045_v5  ;;  %4647 = vst [vmem:[#allocation15_spill] sm:$0xff] %v3049_v6 }
  0xfb   : > { %v498_v43 = vmul.f32 %v473_v38, %v3009_v42  ;;  %v500_v58 = vmul.f32 %v473_v38, %v3017_v47  ;;  %v499_v59 = vmul.f32 %v473_v38, %v3022_v39  ;;  %4648 = vst [vmem:[#allocation16_spill] sm:$0xff] %v3063_v44 }
  0xfd   : > { %543 = vrot.lane.b32.xlu0 %v489_v9, %s2649_s7  ;;  %545 = vrot.lane.b32.xlu1 %v490_v10, %s2649_s7  ;;  %v503_v10 = vmul.f32 %v477_v60, %v3045_v5 }
  0xfe   : > { %v481_v57 = vpop.permute.xlu1 %480 }
  0xff   : > { %v504_v9 = vmul.f32 %v481_v57, %v3049_v6 }
 0x101   : > { %547 = vrot.lane.b32.xlu0 %v491_v14, %s2649_s7  ;;  %549 = vrot.lane.b32.xlu1 %v492_v15, %s2649_s7  ;;  %v3068_v14 = vsel %vm316_vm0, %v2930_v54, %v2916_v46  ;;  %v506_v15 = vmul.f32 %v481_v57, %v3063_v44 }
 0x102   : > { %v3039_v4 = vpop.permute.xlu1 %639  ;;  %4649 = vst [vmem:[#allocation17_spill] sm:$0xff] %v3068_v14 }
 0x103   : > { %v3057_v11 = vsel %vm641_vm1, %v3051_v52, %v3039_v4  ;;  %v648_v46 = vmul.f32 %v3039_v4, %v2946_v62 }
 0x105   : > { %551 = vrot.lane.b32.xlu0 %v493_v18, %s2649_s7  ;;  %553 = vrot.lane.b32.xlu1 %v494_v25, %s2649_s7  ;;  %v505_v18 = vmul.f32 %v481_v57, %v3068_v14  ;;  %v647_v25 = vmul.f32 %v3057_v11, %v2936_v56  ;;  %v704_v57 = vmul.f32 %v672_v27, %v648_v46 }
 0x106   : > { %v676_v54 = vpop.permute.xlu1 %675  ;;  %v656_v46 = vmul.f32 %v3057_v11, %v2986_v17 }
 0x109   : > { %557 = vrot.lane.b32.xlu1 %v496_v36, %s2649_s7  ;;  %555 = vrot.lane.b32.xlu0 %v495_v37, %s2649_s7  ;;  %v646_v36 = vmul.f32 %v3051_v52, %v2933_v55  ;;  %v703_v37 = vmul.f32 %v672_v27, %v647_v25  ;;  %v684_v25 = vpop.permute.xlu0 %683 }
 0x10b   : > { %v702_v38 = vmul.f32 %v672_v27, %v646_v36  ;;  %v654_v27 = vmul.f32 %v3039_v4, %v2973_v12  ;;  %v655_v36 = vmul.f32 %v3051_v52, %v2976_v13 }
 0x10d   : > { %561 = vrot.lane.b32.xlu1 %v498_v43, %s2649_s7  ;;  %559 = vrot.lane.b32.xlu0 %v497_v45, %s2649_s7  ;;  %v649_v43 = vmul.f32 %v3051_v52, %v2943_v61 }
 0x10f   : > { %v705_v45 = vmul.f32 %v676_v54, %v649_v43  ;;  %v712_v43 = vmul.f32 %v684_v25, %v656_v46  ;;  %v664_v46 = vmul.f32 %v3051_v52, %v3035_v0 }
 0x111   : > { %565 = vrot.lane.b32.xlu1 %v500_v58, %s2649_s7  ;;  %563 = vrot.lane.b32.xlu0 %v499_v59, %s2649_s7  ;;  %v650_v58 = vmul.f32 %v3057_v11, %v2953_v2  ;;  %v651_v59 = vmul.f32 %v3039_v4, %v2956_v3 }
 0x113   : > { %v707_v60 = vmul.f32 %v676_v54, %v651_v59  ;;  %v659_v59 = vmul.f32 %v3057_v11, %v2994_v34 }
 0x115   : > { %569 = vrot.lane.b32.xlu1 %v502_v41, %s2649_s7  ;;  %567 = vrot.lane.b32.xlu0 %v501_v49, %s2649_s7  ;;  %v706_v41 = vmul.f32 %v676_v54, %v650_v58  ;;  %v680_v49 = vpop.permute.xlu1 %679  ;;  %v657_v54 = vmul.f32 %v3039_v4, %v2983_v16  ;;  %v658_v58 = vmul.f32 %v3051_v52, %v2997_v35 }
 0x119   : > { %573 = vrot.lane.b32.xlu1 %v504_v9, %s2649_s7  ;;  %571 = vrot.lane.b32.xlu0 %v503_v10, %s2649_s7  ;;  %v653_v9 = vmul.f32 %v3057_v11, %v2963_v7  ;;  %v652_v10 = vmul.f32 %v3051_v52, %v2966_v8 }
 0x11d   : > { %577 = vrot.lane.b32.xlu1 %v506_v15, %s2649_s7  ;;  %575 = vrot.lane.b32.xlu0 %v505_v18, %s2649_s7  ;;  %v709_v15 = vmul.f32 %v680_v49, %v653_v9  ;;  %v708_v18 = vmul.f32 %v680_v49, %v652_v10  ;;  %v660_v9 = vmul.f32 %v3039_v4, %v3005_v40 }
 0x11e   : > { %v661_v10 = vmul.f32 %v3051_v52, %v3009_v42 }
 0x121   : > { %752 = vrot.lane.b32.xlu0 %v703_v37, %s2650_s9  ;;  %750 = vrot.lane.b32.xlu1 %v702_v38, %s2650_s9  ;;  %v710_v37 = vmul.f32 %v680_v49, %v654_v27  ;;  %v711_v38 = vmul.f32 %v684_v25, %v655_v36  ;;  %v692_v49 = vpop.permute.xlu0 %691  ;;  %v663_v27 = vmul.f32 %v3039_v4, %v3017_v47 }
 0x125   : > { %756 = vrot.lane.b32.xlu0 %v705_v45, %s2650_s9  ;;  %754 = vrot.lane.b32.xlu1 %v704_v57, %s2650_s9  ;;  %v713_v45 = vmul.f32 %v684_v25, %v657_v54  ;;  %v688_v57 = vpop.permute.xlu1 %687  ;;  %v662_v25 = vmul.f32 %v3057_v11, %v3022_v39  ;;  %v665_v54 = vmul.f32 %v3057_v11, %v3031_v63 }
 0x127   : > { %v718_v36 = vmul.f32 %v692_v49, %v662_v25 }
 0x129   : > { %760 = vrot.lane.b32.xlu0 %v707_v60, %s2650_s9  ;;  %758 = vrot.lane.b32.xlu1 %v706_v41, %s2650_s9  ;;  %v714_v60 = vmul.f32 %v688_v57, %v658_v58  ;;  %v715_v41 = vmul.f32 %v688_v57, %v659_v59  ;;  %v666_v58 = vmul.f32 %v3039_v4, %v3045_v5 }
 0x12a   : > { %v667_v59 = vmul.f32 %v3051_v52, %v3049_v6 }
 0x12d   : > { %764 = vrot.lane.b32.xlu0 %v709_v15, %s2650_s9  ;;  %762 = vrot.lane.b32.xlu1 %v708_v18, %s2650_s9  ;;  %v716_v15 = vmul.f32 %v688_v57, %v660_v9  ;;  %v717_v18 = vmul.f32 %v692_v49, %v661_v10  ;;  %v700_v57 = vpop.permute.xlu0 %699  ;;  %v669_v9 = vmul.f32 %v3039_v4, %v3063_v44 }
 0x131   : > { %766 = vrot.lane.b32.xlu1 %v710_v37, %s2650_s9  ;;  %768 = vrot.lane.b32.xlu0 %v711_v38, %s2650_s9  ;;  %v719_v37 = vmul.f32 %v692_v49, %v663_v27  ;;  %v696_v38 = vpop.permute.xlu1 %695  ;;  %v668_v49 = vmul.f32 %v3057_v11, %v3068_v14 }
 0x133   : > { %v724_v10 = vmul.f32 %v700_v57, %v668_v49  ;;  %v2652_v49 = vmov 4  }
 0x135   : > { %770 = vrot.lane.b32.xlu1 %v712_v43, %s2650_s9  ;;  %772 = vrot.lane.b32.xlu0 %v713_v45, %s2650_s9  ;;  %v720_v43 = vmul.f32 %v696_v38, %v664_v46  ;;  %v721_v45 = vmul.f32 %v696_v38, %v665_v54 }
 0x139   : > { %774 = vrot.lane.b32.xlu1 %v714_v60, %s2650_s9  ;;  %776 = vrot.lane.b32.xlu0 %v715_v41, %s2650_s9  ;;  %v722_v60 = vmul.f32 %v696_v38, %v666_v58  ;;  %v723_v41 = vmul.f32 %v700_v57, %v667_v59 }
 0x13d   : > { %778 = vrot.lane.b32.xlu1 %v716_v15, %s2650_s9  ;;  %780 = vrot.lane.b32.xlu0 %v717_v18, %s2650_s9  ;;  %v725_v15 = vmul.f32 %v700_v57, %v669_v9  ;;  %v365_v18 = vld [vmem:[%s4561_s4] ss:$2 sm:$0x3] }
 0x13e   : > { %v3151_v52 = vrot.slane %v365_v18, %v371_v23  ;;  %v3155_v4 = vrot.slane %v365_v18, %v375_v32 }
 0x140   : > { %4650 = vst [vmem:[#allocation18_spill] sm:$0xff] %v3151_v52  ;;  %4651 = vst [vmem:[#allocation19_spill] sm:$0xff] %v3155_v4 }
 0x141   : > { %782 = vrot.lane.b32.xlu1 %v718_v36, %s2650_s9  ;;  %784 = vrot.lane.b32.xlu0 %v719_v37, %s2650_s9 }
 0x145   : > { %786 = vrot.lane.b32.xlu1 %v720_v43, %s2650_s9  ;;  %788 = vrot.lane.b32.xlu0 %v721_v45, %s2650_s9 }
 0x149   : > { %790 = vrot.lane.b32.xlu1 %v722_v60, %s2650_s9  ;;  %792 = vrot.lane.b32.xlu0 %v723_v41, %s2650_s9 }
 0x14d   : > { %794 = vrot.lane.b32.xlu1 %v724_v10, %s2650_s9  ;;  %796 = vrot.lane.b32.xlu0 %v725_v15, %s2650_s9  ;;  %s2663_s9 = smov 96  }
 0x151   : > { %847 = vrot.lane.b32.xlu1 %v3151_v52, %s2651_s13  ;;  %849 = vrot.lane.b32.xlu0 %v3155_v4, %s2651_s13 }
 0x155   : > { %881 = vperm.xlu1 %2504, %v2874_v28   ;;  %885 = vperm.xlu0 %2505, %v2836_v19  }
 0x159   : > { %889 = vperm.xlu1 %2504, %v2845_v21   ;;  %897 = vperm.xlu0 %2505, %v2850_v22  }
 0x15d   : > { %893 = vperm.xlu1 %2504, %v2881_v29   ;;  %905 = vperm.xlu0 %2505, %v2858_v24  }
 0x161   : > { %901 = vperm.xlu1 %2504, %v2888_v30   ;;  %2506 = vset.pattern.permute.xlu0 %v2652_v49 }
 0x163   : > { %v3168_v20 = vpop.permute.xlu1 %533  ;;  %v3170_v23 = vpop.permute.xlu0 %531 }
 0x164   : > { %4652 = vst [vmem:[#allocation20_spill] sm:$0xff] %v3168_v20  ;;  %4653 = vst [vmem:[#allocation21_spill] sm:$0xff] %v3170_v23 }
 0x165   : > { %909 = vperm.xlu1 %2504, %v2895_v31  }
 0x167   : > { %v3173_v32 = vpop.permute.xlu1 %537  ;;  %v3175_v11 = vpop.permute.xlu0 %535 }
 0x168   : > { %4654 = vst [vmem:[#allocation22_spill] sm:$0xff] %v3173_v32  ;;  %4655 = vst [vmem:[#allocation23_spill] sm:$0xff] %v3175_v11 }
 0x169   : > { %2507 = vset.pattern.permute.xlu1 %v2652_v49  ;;  %v383_v49 = vmul.f32 %v3151_v52, %v2966_v8 }
 0x16b   : > { %v3177_v25 = vpop.permute.xlu1 %541  ;;  %v3179_v27 = vpop.permute.xlu0 %539  ;;  %v439_v11 = vmul.f32 %v2922_v50, %v383_v49 }
 0x16c   : > { %4656 = vst [vmem:[#allocation24_spill] sm:$0xff] %v3177_v25  ;;  %4657 = vst [vmem:[#allocation25_spill] sm:$0xff] %v3179_v27 }
 0x16f   : > { %v3181_v36 = vpop.permute.xlu1 %545  ;;  %v544_v37 = vpop.permute.xlu0 %543 }
 0x170   : > { %4658 = vst [vmem:[#allocation26_spill] sm:$0xff] %v3181_v36  ;;  %v584_v20 = vsel %vm579_vm2, %v544_v37, %v3181_v36 }
 0x173   : > { %v3183_v38 = vpop.permute.xlu1 %549  ;;  %v3185_v46 = vpop.permute.xlu0 %547 }
 0x174   : > { %4659 = vst [vmem:[#allocation27_spill] sm:$0xff] %v3185_v46 }
 0x177   : > { %v3187_v54 = vpop.permute.xlu1 %553  ;;  %v3189_v43 = vpop.permute.xlu0 %551 }
 0x178   : > { %4660 = vst [vmem:[#allocation28_spill] sm:$0xff] %v3187_v54  ;;  %4661 = vst [vmem:[#allocation29_spill] sm:$0xff] %v3189_v43 }
 0x17b   : > { %v558_v45 = vpop.permute.xlu1 %557  ;;  %v556_v57 = vpop.permute.xlu0 %555 }
 0x17f   : > { %v3191_v58 = vpop.permute.xlu1 %561  ;;  %v560_v59 = vpop.permute.xlu0 %559 }
 0x180   : > { %4662 = vst [vmem:[#allocation30_spill] sm:$0xff] %v3191_v58 }
 0x183   : > { %v3193_v60 = vpop.permute.xlu1 %565  ;;  %v3195_v41 = vpop.permute.xlu0 %563 }
 0x184   : > { %4663 = vst [vmem:[#allocation31_spill] sm:$0xff] %v3195_v41 }
 0x187   : > { %v570_v9 = vpop.permute.xlu1 %569  ;;  %v568_v10 = vpop.permute.xlu0 %567 }
 0x18b   : > { %v3197_v15 = vpop.permute.xlu1 %573  ;;  %v572_v18 = vpop.permute.xlu0 %571 }
 0x18c   : > { %4664 = vst [vmem:[#allocation32_spill] sm:$0xff] %v3197_v15 }
 0x18f   : > { %v3199_v1 = vpop.permute.xlu1 %577  ;;  %v3201_v46 = vpop.permute.xlu0 %575 }
 0x190   : > { %4665 = vst [vmem:[#allocation33_spill] sm:$0xff] %v3199_v1  ;;  %4666 = vst [vmem:[#allocation34_spill] sm:$0xff] %v3201_v46 }
 0x193   : > { %v3203_v54 = vpop.permute.xlu1 %750  ;;  %v3205_v23 = vpop.permute.xlu0 %752 }
 0x194   : > { %4667 = vst [vmem:[#allocation35_spill] sm:$0xff] %v3203_v54  ;;  %4668 = vst [vmem:[#allocation36_spill] sm:$0xff] %v3205_v23  ;;  %v616_v54 = vadd.f32 %v584_v20, %v439_v11  ;;  %v588_v20 = vsel %vm579_vm2, %v556_v57, %v558_v45 }
 0x197   : > { %v3207_v32 = vpop.permute.xlu1 %754  ;;  %v3209_v48 = vpop.permute.xlu0 %756 }
 0x198   : > { %4669 = vst [vmem:[#allocation37_spill] sm:$0xff] %v3207_v32  ;;  %4670 = vst [vmem:[#allocation38_spill] sm:$0xff] %v3209_v48 }
 0x19b   : > { %v3213_v27 = vpop.permute.xlu1 %758  ;;  %v3215_v25 = vpop.permute.xlu0 %760 }
 0x19c   : > { %4671 = vst [vmem:[#allocation39_spill] sm:$0xff] %v3213_v27  ;;  %4672 = vst [vmem:[#allocation40_spill] sm:$0xff] %v3215_v25  ;;  %v387_v25 = vmul.f32 %v3151_v52, %v2997_v35 }
 0x19e   : > { %v443_v11 = vmul.f32 %v2924_v51, %v387_v25 }
 0x19f   : > { %v763_v23 = vpop.permute.xlu1 %762  ;;  %v3220_v1 = vpop.permute.xlu0 %764 }
 0x1a0   : > { %4673 = vst [vmem:[#allocation41_spill] sm:$0xff] %v3220_v1  ;;  %v803_v48 = vsel %vm798_vm3, %v763_v23, %v3220_v1  ;;  %v388_v23 = vmul.f32 %v3155_v4, %v2994_v34 }
 0x1a1   : > { %v3224_v32 = vadd.f32 %v803_v48, %v616_v54  ;;  %v620_v48 = vadd.f32 %v588_v20, %v443_v11  ;;  %v391_v20 = vmul.f32 %v3151_v52, %v3035_v0 }
 0x1a2   : > { %v444_v36 = vmul.f32 %v2924_v51, %v388_v23  ;;  %v392_v51 = vmul.f32 %v3155_v4, %v3031_v63 }
 0x1a3   : > { %v3226_v15 = vpop.permute.xlu1 %766  ;;  %v3228_v27 = vpop.permute.xlu0 %768 }
 0x1a4   : > { %4674 = vst [vmem:[#allocation42_spill] sm:$0xff] %v3226_v15  ;;  %v589_v15 = vsel %vm579_vm2, %v558_v45, %v560_v59  ;;  %v592_v59 = vsel %vm579_vm2, %v568_v10, %v570_v9 }
 0x1a5   : > { %v621_v58 = vadd.f32 %v589_v15, %v444_v36 }
 0x1a7   : > { %v3232_v37 = vpop.permute.xlu1 %770  ;;  %v3234_v49 = vpop.permute.xlu0 %772 }
 0x1a8   : > { %4675 = vst [vmem:[#allocation43_spill] sm:$0xff] %v3232_v37  ;;  %4676 = vst [vmem:[#allocation44_spill] sm:$0xff] %v3234_v49 }
 0x1ab   : > { %v775_v54 = vpop.permute.xlu1 %774  ;;  %v777_v1 = vpop.permute.xlu0 %776 }
 0x1ac   : > { %v807_v50 = vsel %vm798_vm3, %v775_v54, %v777_v1 }
 0x1ad   : > { %v3243_v46 = vadd.f32 %v807_v50, %v620_v48  ;;  %v447_v50 = vmul.f32 %v2928_v53, %v391_v20 }
 0x1af   : > { %v779_v49 = vpop.permute.xlu1 %778  ;;  %v3245_v41 = vpop.permute.xlu0 %780  ;;  %v624_v36 = vadd.f32 %v592_v59, %v447_v50 }
 0x1b0   : > { %4677 = vst [vmem:[#allocation45_spill] sm:$0xff] %v3245_v41  ;;  %v808_v25 = vsel %vm798_vm3, %v777_v1, %v779_v49  ;;  %v593_v1 = vsel %vm579_vm2, %v570_v9, %v572_v18  ;;  %v448_v49 = vmul.f32 %v2928_v53, %v392_v51 }
 0x1b1   : > { %v3248_v57 = vadd.f32 %v808_v25, %v621_v58 }
 0x1b2   : > { %v625_v54 = vadd.f32 %v593_v1, %v448_v49 }
 0x1b3   : > { %v3252_v11 = vpop.permute.xlu1 %782  ;;  %v3254_v45 = vpop.permute.xlu0 %784 }
 0x1b4   : > { %4678 = vst [vmem:[#allocation46_spill] sm:$0xff] %v3252_v11 }
 0x1b7   : > { %v787_v15 = vpop.permute.xlu1 %786  ;;  %v789_v23 = vpop.permute.xlu0 %788 }
 0x1b8   : > { %v811_v58 = vsel %vm798_vm3, %v787_v15, %v789_v23 }
 0x1b9   : > { %v3263_v48 = vadd.f32 %v811_v58, %v624_v36 }
 0x1bb   : > { %v791_v25 = vpop.permute.xlu1 %790  ;;  %v3268_v20 = vpop.permute.xlu0 %792 }
 0x1bc   : > { %v812_v10 = vsel %vm798_vm3, %v789_v23, %v791_v25  ;;  %4679 = vst [vmem:[#allocation47_spill] sm:$0xff] %v3268_v20 }
 0x1bd   : > { %v3266_v41 = vadd.f32 %v812_v10, %v625_v54 }
 0x1bf   : > { %v3270_v11 = vpop.permute.xlu1 %794  ;;  %v3272_v59 = vpop.permute.xlu0 %796 }
 0x1c0   : > { %4680 = vst [vmem:[#allocation48_spill] sm:$0xff] %v3272_v59 }
 0x1c3   : > { %v3274_v50 = vpop.permute.xlu1 %847  ;;  %v3276_v9 = vpop.permute.xlu0 %849 }
 0x1c4   : > { %v3280_v53 = vsel %vm851_vm4, %v3274_v50, %v3276_v9  ;;  %v856_v51 = vmul.f32 %v3274_v50, %v2933_v55  ;;  %v859_v58 = vmul.f32 %v3274_v50, %v2943_v61  ;;  %v858_v49 = vmul.f32 %v3276_v9, %v2946_v62 }
 0x1c5   : > { %v857_v18 = vmul.f32 %v3280_v53, %v2936_v56  ;;  %v861_v10 = vmul.f32 %v3276_v9, %v2956_v3 }
 0x1d4   : > { %v882_v36 = vpop.permute.xlu1 %881  ;;  %v886_v1 = vpop.permute.xlu0 %885 }
 0x1d5   : > { %v913_v15 = vmul.f32 %v882_v36, %v857_v18  ;;  %v912_v23 = vmul.f32 %v882_v36, %v856_v51  ;;  %v915_v54 = vmul.f32 %v886_v1, %v859_v58  ;;  %v914_v25 = vmul.f32 %v882_v36, %v858_v49 }
 0x1d6   : > { %v860_v18 = vmul.f32 %v3280_v53, %v2953_v2  ;;  %v917_v59 = vmul.f32 %v886_v1, %v861_v10  ;;  %v862_v36 = vmul.f32 %v3274_v50, %v2966_v8 }
 0x1d7   : > { %960 = vrot.lane.b32.xlu0 %v912_v23, %s2653_s17  ;;  %962 = vrot.lane.b32.xlu1 %v913_v15, %s2653_s17  ;;  %v863_v15 = vmul.f32 %v3280_v53, %v2963_v7 }
 0x1d8   : > { %v890_v51 = vpop.permute.xlu1 %889  ;;  %v916_v23 = vmul.f32 %v886_v1, %v860_v18  ;;  %v864_v1 = vmul.f32 %v3276_v9, %v2973_v12 }
 0x1d9   : > { %v919_v58 = vmul.f32 %v890_v51, %v863_v15  ;;  %v918_v49 = vmul.f32 %v890_v51, %v862_v36 }
 0x1da   : > { %v920_v18 = vmul.f32 %v890_v51, %v864_v1 }
 0x1db   : > { %964 = vrot.lane.b32.xlu0 %v914_v25, %s2653_s17  ;;  %966 = vrot.lane.b32.xlu1 %v915_v54, %s2653_s17  ;;  %v865_v54 = vmul.f32 %v3274_v50, %v2976_v13 }
 0x1dc   : > { %v894_v25 = vpop.permute.xlu1 %893 }
 0x1dd   : > { %v921_v10 = vmul.f32 %v894_v25, %v865_v54  ;;  %v869_v54 = vmul.f32 %v3280_v53, %v2994_v34 }
 0x1df   : > { %968 = vrot.lane.b32.xlu0 %v916_v23, %s2653_s17  ;;  %970 = vrot.lane.b32.xlu1 %v917_v59, %s2653_s17  ;;  %v866_v59 = vmul.f32 %v3280_v53, %v2986_v17  ;;  %v867_v23 = vmul.f32 %v3276_v9, %v2983_v16 }
 0x1e0   : > { %v902_v20 = vpop.permute.xlu1 %901 }
 0x1e1   : > { %v922_v15 = vmul.f32 %v894_v25, %v866_v59  ;;  %v923_v36 = vmul.f32 %v894_v25, %v867_v23  ;;  %v871_v25 = vmul.f32 %v3274_v50, %v3009_v42  ;;  %v872_v23 = vmul.f32 %v3280_v53, %v3022_v39 }
 0x1e3   : > { %972 = vrot.lane.b32.xlu0 %v918_v49, %s2653_s17  ;;  %974 = vrot.lane.b32.xlu1 %v919_v58, %s2653_s17  ;;  %v898_v49 = vpop.permute.xlu0 %897  ;;  %v868_v58 = vmul.f32 %v3274_v50, %v2997_v35  ;;  %v927_v59 = vmul.f32 %v902_v20, %v871_v25 }
 0x1e4   : > { %v925_v1 = vmul.f32 %v898_v49, %v869_v54  ;;  %v910_v25 = vpop.permute.xlu1 %909 }
 0x1e5   : > { %v924_v51 = vmul.f32 %v898_v49, %v868_v58 }
 0x1e7   : > { %976 = vrot.lane.b32.xlu0 %v920_v18, %s2653_s17  ;;  %978 = vrot.lane.b32.xlu1 %v921_v10, %s2653_s17  ;;  %v870_v18 = vmul.f32 %v3276_v9, %v3005_v40  ;;  %v906_v54 = vpop.permute.xlu0 %905 }
 0x1e9   : > { %v926_v10 = vmul.f32 %v898_v49, %v870_v18  ;;  %v875_v49 = vmul.f32 %v3280_v53, %v3031_v63 }
 0x1eb   : > { %980 = vrot.lane.b32.xlu0 %v922_v15, %s2653_s17  ;;  %982 = vrot.lane.b32.xlu1 %v923_v36, %s2653_s17  ;;  %v873_v15 = vmul.f32 %v3276_v9, %v3017_v47  ;;  %v928_v36 = vmul.f32 %v902_v20, %v872_v23  ;;  %v931_v18 = vmul.f32 %v906_v54, %v875_v49 }
 0x1ed   : > { %v929_v58 = vmul.f32 %v902_v20, %v873_v15  ;;  %v877_v20 = vmul.f32 %v3274_v50, %v3049_v6  ;;  %v878_v15 = vmul.f32 %v3280_v53, %v3068_v14 }
 0x1ef   : > { %986 = vrot.lane.b32.xlu1 %v925_v1, %s2653_s17  ;;  %984 = vrot.lane.b32.xlu0 %v924_v51, %s2653_s17  ;;  %v874_v1 = vmul.f32 %v3274_v50, %v3035_v0  ;;  %v933_v23 = vmul.f32 %v910_v25, %v877_v20  ;;  %v4579_v50 = vmov 5  }
 0x1f1   : > { %v930_v51 = vmul.f32 %v906_v54, %v874_v1 }
 0x1f3   : > { %990 = vrot.lane.b32.xlu1 %v927_v59, %s2653_s17  ;;  %988 = vrot.lane.b32.xlu0 %v926_v10, %s2653_s17  ;;  %v876_v59 = vmul.f32 %v3276_v9, %v3045_v5 }
 0x1f5   : > { %v932_v10 = vmul.f32 %v906_v54, %v876_v59 }
 0x1f7   : > { %994 = vrot.lane.b32.xlu1 %v929_v58, %s2653_s17  ;;  %992 = vrot.lane.b32.xlu0 %v928_v36, %s2653_s17  ;;  %v879_v36 = vmul.f32 %v3276_v9, %v3063_v44  ;;  %v934_v58 = vmul.f32 %v910_v25, %v878_v15  ;;  %v4577_v9 = vmov 7  }
 0x1f9   : > { %v935_v1 = vmul.f32 %v910_v25, %v879_v36 }
 0x1fb   : > { %998 = vrot.lane.b32.xlu1 %v931_v18, %s2653_s17  ;;  %996 = vrot.lane.b32.xlu0 %v930_v51, %s2653_s17 }
 0x1ff   : > { %1002 = vrot.lane.b32.xlu1 %v933_v23, %s2653_s17  ;;  %1000 = vrot.lane.b32.xlu0 %v932_v10, %s2653_s17 }
 0x203   : > { %1006 = vrot.lane.b32.xlu1 %v935_v1, %s2653_s17  ;;  %1004 = vrot.lane.b32.xlu0 %v934_v58, %s2653_s17 }
 0x207   : > { %1062 = vperm.xlu1 %2507, %v2836_v19   ;;  %1058 = vperm.xlu0 %2506, %v2874_v28  }
 0x20b   : > { %1066 = vperm.xlu1 %2507, %v2845_v21   ;;  %1070 = vperm.xlu0 %2506, %v2881_v29  }
 0x20f   : > { %1074 = vperm.xlu1 %2507, %v2850_v22   ;;  %1078 = vperm.xlu0 %2506, %v2888_v30  }
 0x213   : > { %1082 = vperm.xlu1 %2507, %v2858_v24   ;;  %1086 = vperm.xlu0 %2506, %v2895_v31  }
 0x217   : > { %2508 = vset.pattern.permute.xlu1 %v4579_v50  ;;  %2511 = vset.pattern.permute.xlu0 %v4577_v9 }
 0x249   : > { %v3364_v53 = vpop.permute.xlu1 %962  ;;  %v3366_v54 = vpop.permute.xlu0 %960 }
 0x24a   : > { %4681 = vst [vmem:[#allocation49_spill] sm:$0xff] %v3364_v53  ;;  %4682 = vst [vmem:[#allocation50_spill] sm:$0xff] %v3366_v54 }
 0x24d   : > { %v3368_v49 = vpop.permute.xlu1 %966  ;;  %v3370_v51 = vpop.permute.xlu0 %964 }
 0x24e   : > { %4683 = vst [vmem:[#allocation51_spill] sm:$0xff] %v3368_v49  ;;  %4684 = vst [vmem:[#allocation52_spill] sm:$0xff] %v3370_v51 }
 0x251   : > { %v3372_v18 = vpop.permute.xlu1 %970  ;;  %v3374_v25 = vpop.permute.xlu0 %968 }
 0x252   : > { %4685 = vst [vmem:[#allocation53_spill] sm:$0xff] %v3372_v18  ;;  %4686 = vst [vmem:[#allocation54_spill] sm:$0xff] %v3374_v25 }
 0x255   : > { %v3376_v24 = vpop.permute.xlu1 %974  ;;  %v973_v59 = vpop.permute.xlu0 %972 }
 0x256   : > { %4687 = vst [vmem:[#allocation55_spill] sm:$0xff] %v3376_v24  ;;  %v1013_v20 = vsel %vm1008_vm5, %v973_v59, %v3376_v24 }
 0x257   : > { %v3381_v10 = vadd.f32 %v1013_v20, %v3224_v32 }
 0x259   : > { %4688 = vst [vmem:[#allocation56_spill] sm:$0xff] %v3381_v10  ;;  %v3383_v23 = vpop.permute.xlu1 %978  ;;  %v3385_v15 = vpop.permute.xlu0 %976 }
 0x25a   : > { %4689 = vst [vmem:[#allocation57_spill] sm:$0xff] %v3385_v15 }
 0x25d   : > { %v3387_v36 = vpop.permute.xlu1 %982  ;;  %v3389_v58 = vpop.permute.xlu0 %980 }
 0x25e   : > { %4690 = vst [vmem:[#allocation58_spill] sm:$0xff] %v3387_v36  ;;  %4691 = vst [vmem:[#allocation59_spill] sm:$0xff] %v3389_v58 }
 0x261   : > { %v987_v1 = vpop.permute.xlu1 %986  ;;  %v985_v9 = vpop.permute.xlu0 %984 }
 0x262   : > { %v1017_v50 = vsel %vm1008_vm5, %v985_v9, %v987_v1 }
 0x263   : > { %v3393_v54 = vadd.f32 %v1017_v50, %v3243_v46 }
 0x265   : > { %4692 = vst [vmem:[#allocation60_spill] sm:$0xff] %v3393_v54  ;;  %v3395_v49 = vpop.permute.xlu1 %990  ;;  %v989_v59 = vpop.permute.xlu0 %988 }
 0x266   : > { %v1018_v32 = vsel %vm1008_vm5, %v987_v1, %v989_v59 }
 0x267   : > { %v3399_v20 = vadd.f32 %v1018_v32, %v3248_v57 }
 0x269   : > { %4693 = vst [vmem:[#allocation61_spill] sm:$0xff] %v3399_v20  ;;  %v3401_v24 = vpop.permute.xlu1 %994  ;;  %v3403_v36 = vpop.permute.xlu0 %992 }
 0x26d   : > { %v999_v15 = vpop.permute.xlu1 %998  ;;  %v997_v53 = vpop.permute.xlu0 %996 }
 0x26e   : > { %v1021_v51 = vsel %vm1008_vm5, %v997_v53, %v999_v15 }
 0x26f   : > { %v3407_v9 = vadd.f32 %v1021_v51, %v3263_v48 }
 0x271   : > { %4694 = vst [vmem:[#allocation62_spill] sm:$0xff] %v3407_v9  ;;  %v1001_v46 = vpop.permute.xlu0 %1000  ;;  %v3413_v1 = vpop.permute.xlu1 %1002 }
 0x272   : > { %v1022_v50 = vsel %vm1008_vm5, %v999_v15, %v1001_v46 }
 0x273   : > { %v3411_v54 = vadd.f32 %v1022_v50, %v3266_v41 }
 0x275   : > { %4695 = vst [vmem:[#allocation63_spill] sm:$0xff] %v3411_v54  ;;  %v3415_v57 = vpop.permute.xlu0 %1004  ;;  %v3417_v59 = vpop.permute.xlu1 %1006 }
 0x286   : > { %v1059_v32 = vpop.permute.xlu0 %1058  ;;  %v1063_v18 = vpop.permute.xlu1 %1062 }
 0x287   : > { %v1089_v25 = vmul.f32 %v1059_v32, %v2933_v55  ;;  %v1090_v53 = vmul.f32 %v1059_v32, %v2936_v56  ;;  %v1091_v41 = vmul.f32 %v1059_v32, %v2946_v62  ;;  %v1092_v48 = vmul.f32 %v1063_v18, %v2943_v61 }
 0x288   : > { %v1093_v51 = vmul.f32 %v1063_v18, %v2953_v2  ;;  %v1094_v15 = vmul.f32 %v1063_v18, %v2956_v3 }
 0x289   : > { %1137 = vrot.lane.b32.xlu1 %v1089_v25, %s2656_s26  ;;  %1139 = vrot.lane.b32.xlu0 %v1090_v53, %s2656_s26 }
 0x28a   : > { %v1067_v46 = vpop.permute.xlu1 %1066  ;;  %v1071_v32 = vpop.permute.xlu0 %1070 }
 0x28b   : > { %v1095_v25 = vmul.f32 %v1067_v46, %v2966_v8  ;;  %v1096_v50 = vmul.f32 %v1067_v46, %v2963_v7  ;;  %v1097_v53 = vmul.f32 %v1067_v46, %v2973_v12  ;;  %v1099_v18 = vmul.f32 %v1071_v32, %v2986_v17 }
 0x28c   : > { %v4697_v46 = vmov 7  }
 0x28d   : > { %1141 = vrot.lane.b32.xlu1 %v1091_v41, %s2656_s26  ;;  %1143 = vrot.lane.b32.xlu0 %v1092_v48, %s2656_s26  ;;  %v1098_v41 = vmul.f32 %v1071_v32, %v2976_v13  ;;  %v1100_v48 = vmul.f32 %v1071_v32, %v2983_v16 }
 0x28e   : > { %v3504_v32 = vpop.permute.xlu1 %1074 }
 0x291   : > { %1145 = vrot.lane.b32.xlu1 %v1093_v51, %s2656_s26  ;;  %1147 = vrot.lane.b32.xlu0 %v1094_v15, %s2656_s26  ;;  %v2658_v51 = vmov 6   ;;  %v4696_v15 = vmov 5  }
 0x295   : > { %1149 = vrot.lane.b32.xlu1 %v1095_v25, %s2656_s26  ;;  %1151 = vrot.lane.b32.xlu0 %v1096_v50, %s2656_s26  ;;  %v2661_v25 = vmov 8   ;;  %v2541_v50 = vld [vmem:[%s4558_s1 + $0x38] sm:$0xff] }
 0x299   : > { %1153 = vrot.lane.b32.xlu1 %v1097_v53, %s2656_s26  ;;  %1155 = vrot.lane.b32.xlu0 %v1098_v41, %s2656_s26  ;;  %v3509_v41 = vpop.permute.xlu1 %1082 }
 0x29a   : > { %4700 = vst [vmem:[#allocation65_spill] sm:$0xff] %v3509_v41 }
 0x29d   : > { %1157 = vrot.lane.b32.xlu1 %v1099_v18, %s2656_s26  ;;  %1159 = vrot.lane.b32.xlu0 %v1100_v48, %s2656_s26 }
 0x2a1   : > { %1268 = vperm.xlu1 %2508, %v2874_v28   ;;  %1234 = vrot.lane.b32.xlu0 %v2867_v26, %s2657_s28 }
 0x2a5   : > { %2509 = vset.pattern.permute.xlu1 %v2658_v51  ;;  %1655 = vperm.xlu0 %2511, %v2874_v28  }
 0x2a6   : > { %1478 = vperm.xlu1 %2509, %v2874_v28  }
 0x2a9   : > { %1446 = vrot.lane.b32.xlu0 %v3155_v4, %s2659_s29 }
 0x2aa   : > { %1482 = vperm.xlu1 %2509, %v2836_v19  }
 0x2ad   : > { %1667 = vperm.xlu0 %2511, %v2881_v29  }
 0x2ae   : > { %1236 = vrot.lane.b32.xlu1 %v2903_v33, %s2657_s28  ;;  %s2308_s28 = scalar_lea.sflag [#allocation4], %s2802_s23 }
 0x2af   : > { %2510 = vset.pattern.permute.xlu1 %v4696_v15 }
 0x2b1   : > { %2517 = vset.pattern.permute.xlu0 %v4696_v15 }
 0x2b2   : > { %1280 = vperm.xlu1 %2510, %v2881_v29   ;;  %1272 = vperm.xlu0 %2517, %v2836_v19  }
 0x2b6   : > { %2512 = vset.pattern.permute.xlu1 %v4697_v46  ;;  %1276 = vperm.xlu0 %2517, %v2845_v21  }
 0x2b7   : > { %1659 = vperm.xlu1 %2512, %v2836_v19   ;;  %v2534_v19 = vld [vmem:[%s4558_s1 + $0x8] sm:$0xff] }
 0x2ba   : > { %1284 = vperm.xlu0 %2517, %v2850_v22   ;;  %v2535_v22 = vld [vmem:[%s4558_s1 + $0x30] sm:$0xff] }
 0x2bb   : > { %1444 = vrot.lane.b32.xlu1 %v3151_v52, %s2659_s29 }
 0x2bc   : > { %2513 = vset.pattern.permute.xlu1 %v2658_v51 }
 0x2be   : > { %1831 = vrot.lane.b32.xlu0 %v2867_v26, %s2660_s12  ;;  %v2537_v26 = vld [vmem:[%s4558_s1 + $0x20] sm:$0xff] }
 0x2bf   : > { %1486 = vperm.xlu1 %2513, %v2845_v21   ;;  %v2536_v21 = vld [vmem:[%s4558_s1 + $0x10] sm:$0xff] }
 0x2c2   : > { %1296 = vperm.xlu0 %2517, %v2895_v31   ;;  %v2539_v31 = vld [vmem:[%s4558_s1 + $0x18] sm:$0xff] }
 0x2c3   : > { %2514 = vset.pattern.permute.xlu1 %v2661_v25 }
 0x2c4   : > { %1865 = vperm.xlu1 %2514, %v2874_v28   ;;  %v4698_v28 = vmov 0  }
 0x2c6   : > { %2521 = vset.pattern.permute.xlu0 %v2658_v51 }
 0x2c7   : > { %1490 = vperm.xlu0 %2521, %v2881_v29   ;;  %v2538_v29 = vld [vmem:[%s4558_s1] sm:$0xff] }
 0x2c8   : > { %1869 = vperm.xlu1 %2514, %v2534_v19  }
 0x2cb   : > { %1502 = vperm.xlu0 %2521, %v2535_v22  }
 0x2cc   : > { %2515 = vset.pattern.permute.xlu1 %v4696_v15 }
 0x2cd   : > { %1288 = vperm.xlu1 %2515, %v2888_v30  }
 0x2cf   : > { %2523 = vset.pattern.permute.xlu0 %v2661_v25 }
 0x2d0   : > { %1873 = vperm.xlu0 %2523, %v2536_v21  }
 0x2d1   : > { %2516 = vset.pattern.permute.xlu1 %v4697_v46 }
 0x2d2   : > { %1663 = vperm.xlu1 %2516, %v2536_v21  }
 0x2d4   : > { %1885 = vperm.xlu0 %2523, %v2888_v30  }
 0x2d6   : > { %2518 = vset.pattern.permute.xlu1 %v2658_v51 }
 0x2d7   : > { %1494 = vperm.xlu1 %2518, %v2537_v26  }
 0x2d8   : > { %1889 = vperm.xlu0 %2523, %v2535_v22  }
 0x2db   : > { %1498 = vperm.xlu1 %2518, %v2888_v30   ;;  %v2540_v30 = vld [vmem:[%s4558_s1 + $0x28] sm:$0xff] }
 0x2dc   : > { %2527 = vset.pattern.permute.xlu0 %v4698_v28 }
 0x2dd   : > { %397 = vperm.xlu0 %2527, %v2538_v29  }
 0x2df   : > { %1833 = vrot.lane.b32.xlu1 %v2903_v33, %s2660_s12  ;;  %v3502_v33 = vpop.permute.xlu0 %1078  ;;  %s2662_s12 = smov 110  }
 0x2e0   : > { %2519 = vset.pattern.permute.xlu1 %v2661_v25 }
 0x2e1   : > { %412 = vperm.xlu0 %2527, %v2539_v31  }
 0x2e3   : > { %1877 = vperm.xlu1 %2519, %v2539_v31   ;;  %v3507_v53 = vpop.permute.xlu0 %1086 }
 0x2e4   : > { %4699 = vst [vmem:[#allocation64_spill] sm:$0xff] %v3507_v53 }
 0x2e5   : > { %422 = vperm.xlu0 %2527, %v2540_v30  }
 0x2e7   : > { %2520 = vset.pattern.permute.xlu1 %v4696_v15 }
 0x2e8   : > { %1292 = vperm.xlu1 %2520, %v2535_v22  }
 0x2e9   : > { %432 = vperm.xlu0 %2527, %v2541_v50  }
 0x2ec   : > { %2522 = vset.pattern.permute.xlu1 %v4697_v46 }
 0x2ed   : > { %1671 = vperm.xlu1 %2522, %v2537_v26  }
 0x2f1   : > { %1675 = vperm.xlu1 %2522, %v2540_v30  }
 0x2f5   : > { %2524 = vset.pattern.permute.xlu1 %v2658_v51 }
 0x2f6   : > { %1506 = vperm.xlu1 %2524, %v2541_v50  }
 0x2fa   : > { %2525 = vset.pattern.permute.xlu1 %v2661_v25 }
 0x2fb   : > { %1881 = vperm.xlu1 %2525, %v2537_v26   ;;  %v3511_v18 = vpop.permute.xlu0 %1139  ;;  %v3513_v48 = vpop.permute.xlu1 %1137 }
 0x2fc   : > { %4701 = vst [vmem:[#allocation66_spill] sm:$0xff] %v3511_v18  ;;  %4702 = vst [vmem:[#allocation67_spill] sm:$0xff] %v3513_v48 }
 0x2ff   : > { %2526 = vset.pattern.permute.xlu1 %v4697_v46  ;;  %v3516_v15 = vpop.permute.xlu0 %1143  ;;  %v3518_v19 = vpop.permute.xlu1 %1141 }
 0x300   : > { %1679 = vperm.xlu1 %2526, %v2535_v22   ;;  %4703 = vst [vmem:[#allocation68_spill] sm:$0xff] %v3516_v15  ;;  %4704 = vst [vmem:[#allocation69_spill] sm:$0xff] %v3518_v19 }
 0x303   : > { %v3520_v51 = vpop.permute.xlu0 %1147  ;;  %v3522_v21 = vpop.permute.xlu1 %1145 }
 0x304   : > { %1683 = vperm.xlu1 %2526, %v2541_v50   ;;  %4705 = vst [vmem:[#allocation70_spill] sm:$0xff] %v3520_v51  ;;  %4706 = vst [vmem:[#allocation71_spill] sm:$0xff] %v3522_v21 }
 0x307   : > { %v3525_v26 = vpop.permute.xlu0 %1151  ;;  %v3527_v29 = vpop.permute.xlu1 %1149 }
 0x308   : > { %2528 = vset.pattern.permute.xlu1 %v2661_v25  ;;  %4707 = vst [vmem:[#allocation72_spill] sm:$0xff] %v3525_v26  ;;  %4708 = vst [vmem:[#allocation73_spill] sm:$0xff] %v3527_v29 }
 0x309   : > { %1893 = vperm.xlu1 %2528, %v2541_v50  }
 0x30b   : > { %v3529_v31 = vpop.permute.xlu0 %1155  ;;  %v3531_v46 = vpop.permute.xlu1 %1153 }
 0x30c   : > { %4709 = vst [vmem:[#allocation74_spill] sm:$0xff] %v3529_v31  ;;  %4710 = vst [vmem:[#allocation75_spill] sm:$0xff] %v3531_v46 }
 0x30d   : > { %2529 = vset.pattern.permute.xlu1 %v4698_v28 }
 0x30f   : > { %v3533_v22 = vpop.permute.xlu0 %1159  ;;  %v3535_v30 = vpop.permute.xlu1 %1157 }
 0x310   : > { %4711 = vst [vmem:[#allocation76_spill] sm:$0xff] %v3533_v22  ;;  %4712 = vst [vmem:[#allocation77_spill] sm:$0xff] %v3535_v30 }
 0x313   : > { %v3537_v9 = vpop.permute.xlu0 %1234 }
 0x314   : > { %4713 = vst [vmem:[#allocation78_spill] sm:$0xff] %v3537_v9 }
 0x320   : > { %v1269_v25 = vpop.permute.xlu1 %1268 }
 0x324   : > { %v3539_v50 = vpop.permute.xlu0 %1655 }
 0x325   : > { %v1479_v54 = vpop.permute.xlu1 %1478 }
 0x328   : > { %v3541_v48 = vpop.permute.xlu0 %1446 }
 0x329   : > { %v1483_v28 = vpop.permute.xlu1 %1482 }
 0x32c   : > { %v3543_v15 = vpop.permute.xlu0 %1667 }
 0x32d   : > { %4714 = vst [vmem:[#allocation79_spill] sm:$0xff] %v3543_v15  ;;  %v3545_v18 = vpop.permute.xlu1 %1236 }
 0x32e   : > { %v3549_v46 = vsel %vm1238_vm6, %v3537_v9, %v3545_v18  ;;  %v1245_v22 = vmul.f32 %v3545_v18, %v2946_v62  ;;  %v1248_v30 = vmul.f32 %v3545_v18, %v2956_v3 }
 0x32f   : > { %v1244_v19 = vmul.f32 %v3549_v46, %v2936_v56  ;;  %v1247_v20 = vmul.f32 %v3549_v46, %v2953_v2 }
 0x330   : > { %v1301_v51 = vmul.f32 %v1269_v25, %v1245_v22  ;;  %v1246_v22 = vmul.f32 %v3537_v9, %v2943_v61 }
 0x331   : > { %v3555_v21 = vpop.permute.xlu1 %1280  ;;  %v1273_v10 = vpop.permute.xlu0 %1272  ;;  %v1300_v31 = vmul.f32 %v1269_v25, %v1244_v19  ;;  %v1243_v19 = vmul.f32 %v3537_v9, %v2933_v55 }
 0x332   : > { %1351 = vrot.lane.b32.xlu1 %v1301_v51, %s2662_s12  ;;  %v1304_v29 = vmul.f32 %v1273_v10, %v1248_v30  ;;  %v1303_v26 = vmul.f32 %v1273_v10, %v1247_v20  ;;  %v1302_v44 = vmul.f32 %v1273_v10, %v1246_v22  ;;  %v1455_v51 = vmul.f32 %v3541_v48, %v2946_v62 }
 0x333   : > { %1349 = vrot.lane.b32.xlu0 %v1300_v31, %s2662_s12  ;;  %v1299_v20 = vmul.f32 %v1269_v25, %v1243_v19  ;;  %v1458_v10 = vmul.f32 %v3541_v48, %v2956_v3 }
 0x335   : > { %v3563_v0 = vpop.permute.xlu0 %1276  ;;  %v1514_v63 = vmul.f32 %v1483_v28, %v1458_v10  ;;  %v1251_v10 = vmul.f32 %v3545_v18, %v2973_v12 }
 0x336   : > { %v3565_v53 = vpop.permute.xlu1 %1659  ;;  %1357 = vrot.lane.b32.xlu1 %v1304_v29, %s2662_s12 }
 0x337   : > { %1355 = vrot.lane.b32.xlu0 %v1303_v26, %s2662_s12  ;;  %v1511_v26 = vmul.f32 %v1479_v54, %v1455_v51 }
 0x339   : > { %v3575_v31 = vpop.permute.xlu0 %1284 }
 0x33a   : > { %4715 = vst [vmem:[#allocation80_spill] sm:$0xff] %v3575_v31  ;;  %v3577_v30 = vpop.permute.xlu1 %1444  ;;  %1353 = vrot.lane.b32.xlu1 %v1302_v44, %s2662_s12 }
 0x33b   : > { %1347 = vrot.lane.b32.xlu0 %v1299_v20, %s2662_s12  ;;  %v3583_v29 = vsel %vm1448_vm7, %v3577_v30, %v3541_v48  ;;  %v1456_v51 = vmul.f32 %v3577_v30, %v2943_v61  ;;  %v1453_v15 = vmul.f32 %v3577_v30, %v2933_v55 }
 0x33c   : > { %v1454_v22 = vmul.f32 %v3583_v29, %v2936_v56  ;;  %v1457_v20 = vmul.f32 %v3583_v29, %v2953_v2 }
 0x33d   : > { %v3589_v25 = vpop.permute.xlu0 %1831 }
 0x33e   : > { %v3591_v19 = vpop.permute.xlu1 %1486  ;;  %1561 = vrot.lane.b32.xlu1 %v1511_v26, %s2663_s9  ;;  %v1510_v44 = vmul.f32 %v1479_v54, %v1454_v22  ;;  %v1513_v5 = vmul.f32 %v1483_v28, %v1457_v20  ;;  %v1512_v26 = vmul.f32 %v1483_v28, %v1456_v51  ;;  %v1307_v20 = vmul.f32 %v3563_v0, %v1251_v10 }
 0x340   : > { %1559 = vrot.lane.b32.xlu0 %v1510_v44, %s2663_s9  ;;  %v1509_v44 = vmul.f32 %v1479_v54, %v1453_v15 }
 0x341   : > { %v3599_v41 = vpop.permute.xlu0 %1296 }
 0x342   : > { %4716 = vst [vmem:[#allocation81_spill] sm:$0xff] %v3599_v41  ;;  %1567 = vrot.lane.b32.xlu1 %v1514_v63, %s2663_s9  ;;  %v1250_v63 = vmul.f32 %v3549_v46, %v2963_v7  ;;  %v1254_v41 = vmul.f32 %v3545_v18, %v2983_v16 }
 0x343   : > { %v3604_v31 = vpop.permute.xlu1 %1865 }
 0x344   : > { %1565 = vrot.lane.b32.xlu0 %v1513_v5, %s2663_s9  ;;  %v1253_v5 = vmul.f32 %v3549_v46, %v2986_v17  ;;  %v1306_v28 = vmul.f32 %v3563_v0, %v1250_v63  ;;  %v1310_v15 = vmul.f32 %v3555_v21, %v1254_v41 }
 0x346   : > { %1563 = vrot.lane.b32.xlu1 %v1512_v26, %s2663_s9  ;;  %v3610_v22 = vpop.permute.xlu0 %1490  ;;  %v1309_v26 = vmul.f32 %v3555_v21, %v1253_v5  ;;  %v1691_v5 = vmul.f32 %v3565_v53, %v2956_v3 }
 0x347   : > { %v3621_v51 = vpop.permute.xlu1 %1869 }
 0x348   : > { %1557 = vrot.lane.b32.xlu0 %v1509_v44, %s2663_s9  ;;  %v1688_v44 = vmul.f32 %v3539_v50, %v2946_v62 }
 0x34a   : > { %1363 = vrot.lane.b32.xlu1 %v1307_v20, %s2662_s12  ;;  %v3624_v54 = vpop.permute.xlu0 %1502  ;;  %v1687_v20 = vmul.f32 %v3539_v50, %v2936_v56 }
 0x34b   : > { %4717 = vst [vmem:[#allocation82_spill] sm:$0xff] %v3624_v54 }
 0x34c   : > { %1361 = vrot.lane.b32.xlu0 %v1306_v28, %s2662_s12  ;;  %v3634_v63 = vpop.permute.xlu1 %1288  ;;  %v1252_v28 = vmul.f32 %v3537_v9, %v2976_v13 }
 0x34d   : > { %4719 = vst [vmem:[#allocation84_spill] sm:$0xff] %v3634_v63 }
 0x34e   : > { %1369 = vrot.lane.b32.xlu1 %v1310_v15, %s2662_s12  ;;  %v1690_v15 = vmul.f32 %v3565_v53, %v2953_v2 }
 0x34f   : > { %v3630_v10 = vpop.permute.xlu0 %1873 }
 0x350   : > { %4718 = vst [vmem:[#allocation83_spill] sm:$0xff] %v3630_v10  ;;  %1367 = vrot.lane.b32.xlu0 %v1309_v26, %s2662_s12  ;;  %v1689_v10 = vmul.f32 %v3565_v53, %v2943_v61 }
 0x351   : > { %v3649_v26 = vpop.permute.xlu1 %1663 }
 0x352   : > { %1738 = vrot.lane.b32.xlu1 %v1688_v44, %s2664_s10  ;;  %v1308_v44 = vmul.f32 %v3555_v21, %v1252_v28  ;;  %v1686_v21 = vmul.f32 %v3539_v50, %v2933_v55  ;;  %v385_v28 = vmul.f32 %v3151_v52, %v2976_v13  ;;  %v1102_v50 = vmul.f32 %v3504_v32, %v2994_v34 }
 0x353   : > { %v3640_v41 = vpop.permute.xlu0 %1885 }
 0x354   : > { %4720 = vst [vmem:[#allocation85_spill] sm:$0xff] %v3640_v41  ;;  %1736 = vrot.lane.b32.xlu0 %v1687_v20, %s2664_s10  ;;  %v1249_v41 = vmul.f32 %v3537_v9, %v2966_v8 }
 0x356   : > { %1744 = vrot.lane.b32.xlu1 %v1691_v5, %s2664_s10  ;;  %v1305_v20 = vmul.f32 %v3563_v0, %v1249_v41  ;;  %v3662_v63 = vpop.permute.xlu1 %1494  ;;  %v1103_v0 = vmul.f32 %v3504_v32, %v3005_v40 }
 0x357   : > { %v3652_v54 = vpop.permute.xlu0 %1889  ;;  %4722 = vst [vmem:[#allocation87_spill] sm:$0xff] %v3662_v63 }
 0x358   : > { %4721 = vst [vmem:[#allocation86_spill] sm:$0xff] %v3652_v54  ;;  %1742 = vrot.lane.b32.xlu0 %v1690_v15, %s2664_s10  ;;  %v586_v15 = vsel %vm579_vm2, %v3183_v38, %v3189_v43  ;;  %v1106_v38 = vmul.f32 %v3502_v33, %v3017_v47  ;;  %v394_v54 = vmul.f32 %v3155_v4, %v3068_v14 }
 0x35a   : > { %1365 = vrot.lane.b32.xlu1 %v1308_v44, %s2662_s12 }
 0x35c   : > { %1359 = vrot.lane.b32.xlu0 %v1305_v20, %s2662_s12  ;;  %v3665_v5 = vpop.permute.xlu0 %397  ;;  %v389_v20 = vmul.f32 %v3151_v52, %v3009_v42 }
 0x35d   : > { %4723 = vst [vmem:[#allocation88_spill] sm:$0xff] %v3665_v5  ;;  %v4726_v5 = vld [vmem:[#allocation31_spill] sm:$0xff] }
 0x35e   : > { %1740 = vrot.lane.b32.xlu1 %v1689_v10, %s2664_s10  ;;  %v3683_v10 = vpop.permute.xlu1 %1498 }
 0x35f   : > { %4725 = vst [vmem:[#allocation90_spill] sm:$0xff] %v3683_v10  ;;  %v591_v10 = vsel %vm579_vm2, %v4726_v5, %v3193_v60  ;;  %v4730_v60 = vld [vmem:[#allocation46_spill] sm:$0xff] }
 0x360   : > { %1734 = vrot.lane.b32.xlu0 %v1686_v21, %s2664_s10  ;;  %v3675_v53 = vpop.permute.xlu0 %412  ;;  %v390_v21 = vmul.f32 %v3155_v4, %v3022_v39 }
 0x361   : > { %4724 = vst [vmem:[#allocation89_spill] sm:$0xff] %v3675_v53  ;;  %v441_v41 = vmul.f32 %v3675_v53, %v385_v28  ;;  %v805_v28 = vsel %vm798_vm3, %v3228_v27, %v3232_v37  ;;  %v1105_v27 = vmul.f32 %v3502_v33, %v3022_v39  ;;  %v1461_v37 = vmul.f32 %v3541_v48, %v2973_v12 }
 0x362   : > { %1165 = vrot.lane.b32.xlu1 %v1103_v0, %s2656_s26  ;;  %v393_v0 = vmul.f32 %v3151_v52, %v3049_v6  ;;  %v810_v52 = vsel %vm798_vm3, %v4730_v60, %v3254_v45  ;;  %v1015_v6 = vsel %vm1008_vm5, %v3383_v23, %v3389_v58  ;;  %v4731_v45 = vld [vmem:[#allocation33_spill] sm:$0xff] }
 0x363   : > { %v618_v44 = vadd.f32 %v586_v15, %v441_v41  ;;  %v1517_v63 = vmul.f32 %v3591_v19, %v1461_v37  ;;  %v1020_v37 = vsel %vm1008_vm5, %v3403_v36, %v3401_v24  ;;  %v1463_v24 = vmul.f32 %v3583_v29, %v2986_v17 }
 0x364   : > { %1163 = vrot.lane.b32.xlu0 %v1102_v50, %s2656_s26  ;;  %v423_v43 = vpop.permute.xlu0 %422  ;;  %v1460_v50 = vmul.f32 %v3583_v29, %v2963_v7 }
 0x365   : > { %v837_v41 = vadd.f32 %v805_v28, %v618_v44  ;;  %v445_v15 = vmul.f32 %v423_v43, %v389_v20  ;;  %v446_v53 = vmul.f32 %v423_v43, %v390_v21  ;;  %v4727_v43 = vld [vmem:[#allocation30_spill] sm:$0xff]  ;;  %v4729_v21 = vld [vmem:[#allocation32_spill] sm:$0xff] }
 0x366   : > { %1171 = vrot.lane.b32.xlu1 %v1106_v38, %s2656_s26  ;;  %v590_v44 = vsel %vm579_vm2, %v4727_v43, %v4726_v5  ;;  %v4728_v20 = vld [vmem:[#allocation34_spill] sm:$0xff]  ;;  %v3723_v38 = vpop.permute.xlu1 %1833  ;;  %v1516_v23 = vmul.f32 %v3591_v19, %v1460_v50 }
 0x367   : > { %v594_v28 = vsel %vm579_vm2, %v4729_v21, %v4728_v20  ;;  %v623_v4 = vadd.f32 %v591_v10, %v446_v53  ;;  %v622_v14 = vadd.f32 %v590_v44, %v445_v15  ;;  %v3726_v9 = vadd.f32 %v1015_v6, %v837_v41 }
 0x368   : > { %1169 = vrot.lane.b32.xlu0 %v1105_v27, %s2656_s26  ;;  %v433_v5 = vpop.permute.xlu0 %432  ;;  %v595_v53 = vsel %vm579_vm2, %v4728_v20, %v4731_v45  ;;  %v1464_v10 = vmul.f32 %v3541_v48, %v2983_v16  ;;  %v3740_v6 = vsel %vm1835_vm8, %v3589_v25, %v3723_v38  ;;  %v4733_v27 = vld [vmem:[#allocation47_spill] sm:$0xff]  ;;  %v1019_v20 = vsel %vm1008_vm5, %v3395_v49, %v3403_v36 }
 0x369   : > { %v449_v43 = vmul.f32 %v433_v5, %v393_v0  ;;  %v450_v21 = vmul.f32 %v433_v5, %v394_v54  ;;  %v842_v7 = vadd.f32 %v810_v52, %v623_v4  ;;  %v4732_v0 = vld [vmem:[#allocation45_spill] sm:$0xff]  ;;  %v813_v50 = vsel %vm798_vm3, %v4733_v27, %v3270_v11 }
 0x36a   : > { %1573 = vrot.lane.b32.xlu1 %v1517_v63, %s2663_s9  ;;  %v809_v41 = vsel %vm798_vm3, %v4732_v0, %v4730_v60  ;;  %v1520_v15 = vmul.f32 %v3610_v22, %v1464_v10  ;;  %v1842_v63 = vmul.f32 %v3723_v38, %v2946_v62  ;;  %v1519_v60 = vmul.f32 %v3610_v22, %v1463_v24 }
 0x36b   : > { %v626_v52 = vadd.f32 %v594_v28, %v449_v43  ;;  %v627_v4 = vadd.f32 %v595_v53, %v450_v21  ;;  %v3742_v54 = vadd.f32 %v1020_v37, %v842_v7  ;;  %v4734_v7 = vld [vmem:[#allocation48_spill] sm:$0xff]  ;;  %v841_v28 = vadd.f32 %v809_v41, %v622_v14  ;;  %v3774_v14 = vpop.permute.xlu1 %1877 }
 0x36c   : > { %1571 = vrot.lane.b32.xlu0 %v1516_v23, %s2663_s9  ;;  %v814_v44 = vsel %vm798_vm3, %v3270_v11, %v4734_v7  ;;  %v1841_v62 = vmul.f32 %v3740_v6, %v2936_v56  ;;  %v1024_v21 = vsel %vm1008_vm5, %v3415_v57, %v3417_v59  ;;  %v1023_v11 = vsel %vm1008_vm5, %v3413_v1, %v3415_v57  ;;  %v4737_v7 = vld [vmem:[#allocation80_spill] sm:$0xff] }
 0x36d   : > { %v846_v5 = vadd.f32 %v814_v44, %v627_v4  ;;  %v845_v43 = vadd.f32 %v813_v50, %v626_v52  ;;  %v3769_v45 = vadd.f32 %v1019_v20, %v841_v28  ;;  %v1898_v49 = vmul.f32 %v3604_v31, %v1842_v63  ;;  %v4738_v28 = vld [vmem:[#allocation84_spill] sm:$0xff] }
 0x36e   : > { %1579 = vrot.lane.b32.xlu1 %v1520_v15, %s2663_s9  ;;  %v1845_v36 = vmul.f32 %v3723_v38, %v2956_v3  ;;  %v1897_v59 = vmul.f32 %v3604_v31, %v1841_v62  ;;  %v1844_v1 = vmul.f32 %v3740_v6, %v2953_v2  ;;  %v1104_v10 = vmul.f32 %v3502_v33, %v3009_v42 }
 0x36f   : > { %v3780_v53 = vadd.f32 %v1024_v21, %v846_v5  ;;  %v3782_v37 = vadd.f32 %v1023_v11, %v845_v43  ;;  %v3790_v23 = vpop.permute.xlu1 %1292  ;;  %v1101_v52 = vmul.f32 %v3504_v32, %v2997_v35  ;;  %v1462_v4 = vmul.f32 %v3577_v30, %v2976_v13  ;;  %v4739_v21 = vld [vmem:[#allocation10_spill] sm:$0xff] }
 0x370   : > { %1577 = vrot.lane.b32.xlu0 %v1519_v60, %s2663_s9  ;;  %v1901_v57 = vmul.f32 %v3621_v51, %v1845_v36  ;;  %v1900_v3 = vmul.f32 %v3621_v51, %v1844_v1  ;;  %v1459_v0 = vmul.f32 %v3577_v30, %v2966_v8  ;;  %v1843_v15 = vmul.f32 %v3589_v25, %v2943_v61  ;;  %v4740_v36 = vld [vmem:[#allocation79_spill] sm:$0xff] }
 0x371   : > { %4735 = vst [vmem:[#allocation31_spill] sm:$0xff] %v3780_v53  ;;  %4736 = vst [vmem:[#allocation30_spill] sm:$0xff] %v3782_v37  ;;  %v1518_v41 = vmul.f32 %v3610_v22, %v1462_v4  ;;  %v1840_v32 = vmul.f32 %v3589_v25, %v2933_v55  ;;  %v1257_v22 = vmul.f32 %v3545_v18, %v3005_v40 }
 0x372   : > { %1948 = vrot.lane.b32.xlu1 %v1898_v49, %s2665_s11  ;;  %v1515_v33 = vmul.f32 %v3591_v19, %v1459_v0  ;;  %v1899_v63 = vmul.f32 %v3621_v51, %v1843_v15  ;;  %v1256_v19 = vmul.f32 %v3549_v46, %v2994_v34  ;;  %v1260_v20 = vmul.f32 %v3545_v18, %v3017_v47 }
 0x373   : > { %v3805_v24 = vpop.permute.xlu1 %1671  ;;  %v1896_v27 = vmul.f32 %v3604_v31, %v1840_v32  ;;  %v1313_v44 = vmul.f32 %v4737_v7, %v1257_v22  ;;  %v1259_v31 = vmul.f32 %v3549_v46, %v3022_v39  ;;  %v1694_v43 = vmul.f32 %v3649_v26, %v2973_v12  ;;  %v4743_v32 = vld [vmem:[#allocation14_spill] sm:$0xff] }
 0x374   : > { %1946 = vrot.lane.b32.xlu0 %v1897_v59, %s2665_s11  ;;  %v1312_v51 = vmul.f32 %v4737_v7, %v1256_v19  ;;  %v1316_v60 = vmul.f32 %v4738_v28, %v1260_v20  ;;  %v1693_v11 = vmul.f32 %v3649_v26, %v4739_v21  ;;  %v1697_v59 = vmul.f32 %v4740_v36, %v2983_v16 }
 0x375   : > { %v1315_v5 = vmul.f32 %v4738_v28, %v1259_v31  ;;  %v1696_v1 = vmul.f32 %v4740_v36, %v2986_v17 }
 0x376   : > { %1954 = vrot.lane.b32.xlu1 %v1901_v57, %s2665_s11  ;;  %v4741_v57 = vld [vmem:[#allocation78_spill] sm:$0xff] }
 0x377   : > { %v3819_v50 = vpop.permute.xlu1 %1675 }
 0x378   : > { %1952 = vrot.lane.b32.xlu0 %v1900_v3, %s2665_s11  ;;  %v1258_v3 = vmul.f32 %v4741_v57, %v3009_v42 }
 0x37a   : > { %1167 = vrot.lane.b32.xlu1 %v1104_v10, %s2656_s26  ;;  %v1255_v10 = vmul.f32 %v4741_v57, %v2997_v35 }
 0x37b   : > { %v3833_v62 = vpop.permute.xlu1 %1506 }
 0x37c   : > { %1161 = vrot.lane.b32.xlu0 %v1101_v52, %s2656_s26  ;;  %v1314_v52 = vmul.f32 %v4738_v28, %v1258_v3  ;;  %v1311_v0 = vmul.f32 %v4737_v7, %v1255_v10  ;;  %v4746_v7 = vld [vmem:[#allocation16_spill] sm:$0xff]  ;;  %v1467_v28 = vmul.f32 %v3541_v48, %v3005_v40  ;;  %v1469_v3 = vmul.f32 %v3583_v29, %v3022_v39  ;;  %v4751_v10 = vld [vmem:[#allocation90_spill] sm:$0xff] }
 0x37e   : > { %1575 = vrot.lane.b32.xlu1 %v1518_v41, %s2663_s9  ;;  %v1695_v41 = vmul.f32 %v4740_v36, %v2976_v13 }
 0x37f   : > { %v3843_v49 = vpop.permute.xlu1 %1881 }
 0x380   : > { %1569 = vrot.lane.b32.xlu0 %v1515_v33, %s2663_s9  ;;  %v1692_v33 = vmul.f32 %v3649_v26, %v2966_v8  ;;  %v4749_v26 = vld [vmem:[#allocation17_spill] sm:$0xff] }
 0x382   : > { %1950 = vrot.lane.b32.xlu1 %v1899_v63, %s2665_s11  ;;  %v4744_v63 = vld [vmem:[#allocation65_spill] sm:$0xff] }
 0x383   : > { %v3857_v4 = vpop.permute.xlu1 %1679  ;;  %v1109_v22 = vmul.f32 %v4744_v63, %v4743_v32 }
 0x384   : > { %1944 = vrot.lane.b32.xlu0 %v1896_v27, %s2665_s11  ;;  %v4745_v27 = vld [vmem:[#allocation12_spill] sm:$0xff] }
 0x385   : > { %v1108_v19 = vmul.f32 %v4744_v63, %v4745_v27 }
 0x386   : > { %1375 = vrot.lane.b32.xlu1 %v1313_v44, %s2662_s12  ;;  %v4747_v44 = vld [vmem:[#allocation64_spill] sm:$0xff] }
 0x387   : > { %v3867_v15 = vpop.permute.xlu1 %1683  ;;  %v1111_v31 = vmul.f32 %v4747_v44, %v4749_v26 }
 0x388   : > { %1373 = vrot.lane.b32.xlu0 %v1312_v51, %s2662_s12  ;;  %4742 = vst [vmem:[#allocation34_spill] sm:$0xff] %v3867_v15  ;;  %v1112_v51 = vmul.f32 %v4747_v44, %v4746_v7 }
 0x38a   : > { %1381 = vrot.lane.b32.xlu1 %v1316_v60, %s2662_s12  ;;  %v1466_v60 = vmul.f32 %v3583_v29, %v2994_v34 }
 0x38b   : > { %v3878_v20 = vpop.permute.xlu1 %1893 }
 0x38c   : > { %1379 = vrot.lane.b32.xlu0 %v1315_v5, %s2662_s12  ;;  %4748 = vst [vmem:[#allocation32_spill] sm:$0xff] %v3878_v20  ;;  %v4750_v5 = vld [vmem:[#allocation87_spill] sm:$0xff]  ;;  %v4765_v20 = vld [vmem:[#allocation56_spill] sm:$0xff] }
 0x38e   : > { %1750 = vrot.lane.b32.xlu1 %v1694_v43, %s2664_s10  ;;  %v1523_v43 = vmul.f32 %v4750_v5, %v1467_v28 }
 0x390   : > { %1748 = vrot.lane.b32.xlu0 %v1693_v11, %s2664_s10 }
 0x392   : > { %1756 = vrot.lane.b32.xlu1 %v1697_v59, %s2664_s10  ;;  %v1522_v59 = vmul.f32 %v4750_v5, %v1466_v60 }
 0x394   : > { %1754 = vrot.lane.b32.xlu0 %v1696_v1, %s2664_s10  ;;  %v1470_v1 = vmul.f32 %v3541_v48, %v3017_v47 }
 0x396   : > { %1377 = vrot.lane.b32.xlu1 %v1314_v52, %s2662_s12  ;;  %v1526_v52 = vmul.f32 %v4751_v10, %v1470_v1 }
 0x398   : > { %1371 = vrot.lane.b32.xlu0 %v1311_v0, %s2662_s12 }
 0x39a   : > { %1752 = vrot.lane.b32.xlu1 %v1695_v41, %s2664_s10  ;;  %v1848_v41 = vmul.f32 %v3723_v38, %v2973_v12  ;;  %v1851_v12 = vmul.f32 %v3723_v38, %v2983_v16  ;;  %v4753_v16 = vld [vmem:[#allocation15_spill] sm:$0xff] }
 0x39c   : > { %1746 = vrot.lane.b32.xlu0 %v1692_v33, %s2664_s10  ;;  %v1907_v1 = vmul.f32 %v3774_v14, %v1851_v12  ;;  %v1468_v12 = vmul.f32 %v3577_v30, %v3009_v42 }
 0x39e   : > { %1177 = vrot.lane.b32.xlu1 %v1109_v22, %s2656_s26  ;;  %v1525_v22 = vmul.f32 %v4751_v10, %v1469_v3 }
 0x3a0   : > { %1175 = vrot.lane.b32.xlu0 %v1108_v19, %s2656_s26  ;;  %v1847_v19 = vmul.f32 %v3740_v6, %v4739_v21 }
 0x3a2   : > { %1183 = vrot.lane.b32.xlu1 %v1112_v51, %s2656_s26 }
 0x3a4   : > { %v3889_v11 = vpop.permute.xlu1 %1351  ;;  %1181 = vrot.lane.b32.xlu0 %v1111_v31, %s2656_s26  ;;  %v4752_v31 = vld [vmem:[#allocation83_spill] sm:$0xff] }
 0x3a5   : > { %v3892_v36 = vpop.permute.xlu0 %1349  ;;  %v1904_v28 = vmul.f32 %v4752_v31, %v1848_v41 }
 0x3a6   : > { %1585 = vrot.lane.b32.xlu1 %v1523_v43, %s2663_s9  ;;  %v1850_v43 = vmul.f32 %v3740_v6, %v2986_v17 }
 0x3a8   : > { %v3901_v0 = vpop.permute.xlu1 %1357  ;;  %1583 = vrot.lane.b32.xlu0 %v1522_v59, %s2663_s9  ;;  %v1903_v59 = vmul.f32 %v4752_v31, %v1847_v19  ;;  %v4754_v19 = vld [vmem:[#allocation13_spill] sm:$0xff] }
 0x3a9   : > { %v3906_v33 = vpop.permute.xlu0 %1355 }
 0x3aa   : > { %1591 = vrot.lane.b32.xlu1 %v1526_v52, %s2663_s9  ;;  %v1906_v52 = vmul.f32 %v3774_v14, %v1850_v43 }
 0x3ac   : > { %v3912_v51 = vpop.permute.xlu1 %1353  ;;  %1589 = vrot.lane.b32.xlu0 %v1525_v22, %s2663_s9  ;;  %v1110_v22 = vmul.f32 %v4747_v44, %v4753_v16 }
 0x3ad   : > { %v3916_v60 = vpop.permute.xlu0 %1347 }
 0x3ae   : > { %1960 = vrot.lane.b32.xlu1 %v1904_v28, %s2665_s11  ;;  %v1107_v28 = vmul.f32 %v4744_v63, %v4754_v19  ;;  %v1849_v63 = vmul.f32 %v3589_v25, %v2976_v13 }
 0x3b0   : > { %v3925_v3 = vpop.permute.xlu1 %1561  ;;  %1958 = vrot.lane.b32.xlu0 %v1903_v59, %s2665_s11  ;;  %v1465_v59 = vmul.f32 %v3577_v30, %v2997_v35  ;;  %v1905_v53 = vmul.f32 %v3774_v14, %v1849_v63  ;;  %v1266_v14 = vmul.f32 %v3545_v18, %v4746_v7 }
 0x3b2   : > { %1966 = vrot.lane.b32.xlu1 %v1907_v1, %s2665_s11  ;;  %v3930_v41 = vpop.permute.xlu0 %1559  ;;  %v1524_v1 = vmul.f32 %v4751_v10, %v1468_v12 }
 0x3b4   : > { %v3934_v37 = vpop.permute.xlu1 %1567  ;;  %1964 = vrot.lane.b32.xlu0 %v1906_v52, %s2665_s11  ;;  %v1521_v52 = vmul.f32 %v4750_v5, %v1465_v59  ;;  %v1263_v5 = vmul.f32 %v3545_v18, %v4743_v32 }
 0x3b6   : > { %1179 = vrot.lane.b32.xlu1 %v1110_v22, %s2656_s26  ;;  %v3942_v43 = vpop.permute.xlu0 %1565  ;;  %v1846_v22 = vmul.f32 %v3589_v25, %v2966_v8  ;;  %v1319_v8 = vmul.f32 %v3790_v23, %v1263_v5 }
 0x3b8   : > { %v3947_v44 = vpop.permute.xlu1 %1563  ;;  %1173 = vrot.lane.b32.xlu0 %v1107_v28, %s2656_s26  ;;  %v1902_v10 = vmul.f32 %v4752_v31, %v1846_v22  ;;  %v1262_v28 = vmul.f32 %v3549_v46, %v4745_v27 }
 0x3ba   : > { %1587 = vrot.lane.b32.xlu1 %v1524_v1, %s2663_s9  ;;  %v3954_v58 = vpop.permute.xlu0 %1557  ;;  %v1318_v31 = vmul.f32 %v3790_v23, %v1262_v28  ;;  %v4760_v1 = vld [vmem:[#allocation81_spill] sm:$0xff] }
 0x3bb   : > { %4755 = vst [vmem:[#allocation46_spill] sm:$0xff] %v3954_v58  ;;  %v4781_v58 = vld [vmem:[#allocation39_spill] sm:$0xff] }
 0x3bc   : > { %v3959_v21 = vpop.permute.xlu1 %1363  ;;  %1581 = vrot.lane.b32.xlu0 %v1521_v52, %s2663_s9  ;;  %v1322_v52 = vmul.f32 %v4760_v1, %v1266_v14  ;;  %v4762_v14 = vld [vmem:[#allocation73_spill] sm:$0xff] }
 0x3bd   : > { %4756 = vst [vmem:[#allocation33_spill] sm:$0xff] %v3959_v21  ;;  %v1703_v21 = vmul.f32 %v3819_v50, %v3017_v47 }
 0x3be   : > { %1962 = vrot.lane.b32.xlu1 %v1905_v53, %s2665_s11  ;;  %v3966_v13 = vpop.permute.xlu0 %1361  ;;  %v1265_v53 = vmul.f32 %v3549_v46, %v4749_v26  ;;  %v1699_v46 = vmul.f32 %v3805_v24, %v2994_v34 }
 0x3bf   : > { %4757 = vst [vmem:[#allocation45_spill] sm:$0xff] %v3966_v13 }
 0x3c0   : > { %v3971_v12 = vpop.permute.xlu1 %1369  ;;  %1956 = vrot.lane.b32.xlu0 %v1902_v10, %s2665_s11  ;;  %v1321_v22 = vmul.f32 %v4760_v1, %v1265_v53  ;;  %v1700_v10 = vmul.f32 %v3805_v24, %v3005_v40  ;;  %v4763_v53 = vld [vmem:[#allocation77_spill] sm:$0xff] }
 0x3c1   : > { %4758 = vst [vmem:[#allocation47_spill] sm:$0xff] %v3971_v12 }
 0x3c2   : > { %1387 = vrot.lane.b32.xlu1 %v1319_v8, %s2662_s12  ;;  %v3978_v59 = vpop.permute.xlu0 %1367  ;;  %v4761_v8 = vld [vmem:[#allocation72_spill] sm:$0xff] }
 0x3c3   : > { %4759 = vst [vmem:[#allocation48_spill] sm:$0xff] %v3978_v59 }
 0x3c4   : > { %v3983_v63 = vpop.permute.xlu1 %1738  ;;  %1385 = vrot.lane.b32.xlu0 %v1318_v31, %s2662_s12  ;;  %v1190_v31 = vsel %vm1185_vm9, %v4762_v14, %v4761_v8  ;;  %v1264_v14 = vmul.f32 %v4741_v57, %v4753_v16 }
 0x3c5   : > { %v1222_v15 = vadd.f32 %v1190_v31, %v4765_v20 }
 0x3c6   : > { %1393 = vrot.lane.b32.xlu1 %v1322_v52, %s2662_s12  ;;  %v3988_v18 = vpop.permute.xlu0 %1736  ;;  %v4764_v52 = vld [vmem:[#allocation74_spill] sm:$0xff] }
 0x3c7   : > { %v1192_v12 = vsel %vm1185_vm9, %v4764_v52, %v4763_v53  ;;  %v1702_v52 = vmul.f32 %v3819_v50, %v3022_v39 }
 0x3c8   : > { %v3992_v5 = vpop.permute.xlu1 %1744  ;;  %1391 = vrot.lane.b32.xlu0 %v1321_v22, %s2662_s12  ;;  %v1224_v17 = vadd.f32 %v1192_v12, %v3726_v9  ;;  %v1320_v12 = vmul.f32 %v4760_v1, %v1264_v14  ;;  %v1473_v14 = vmul.f32 %v3541_v48, %v4743_v32 }
 0x3ca   : > { %1762 = vrot.lane.b32.xlu1 %v1700_v10, %s2664_s10  ;;  %v3998_v28 = vpop.permute.xlu0 %1742 }
 0x3cc   : > { %v1366_v22 = vpop.permute.xlu1 %1365  ;;  %1760 = vrot.lane.b32.xlu0 %v1699_v46, %s2664_s10  ;;  %v1261_v46 = vmul.f32 %v4741_v57, %v4754_v19  ;;  %v1701_v57 = vmul.f32 %v3819_v50, %v3009_v42 }
 0x3cd   : > { %v1402_v10 = vsel %vm1395_vm10, %v1366_v22, %v3978_v59 }
 0x3ce   : > { %v4017_v53 = vadd.f32 %v1402_v10, %v1224_v17  ;;  %1768 = vrot.lane.b32.xlu1 %v1703_v21, %s2664_s10  ;;  %v1360_v8 = vpop.permute.xlu0 %1359  ;;  %v4769_v17 = vld [vmem:[#allocation19_spill] sm:$0xff]  ;;  %v1317_v21 = vmul.f32 %v3790_v23, %v1261_v46  ;;  %v4774_v46 = vld [vmem:[#allocation24_spill] sm:$0xff] }
 0x3cf   : > { %v1400_v9 = vsel %vm1395_vm10, %v1360_v8, %v3966_v13  ;;  %v380_v22 = vmul.f32 %v4769_v17, %v2936_v56  ;;  %v4771_v8 = vld [vmem:[#allocation88_spill] sm:$0xff]  ;;  %v1698_v56 = vmul.f32 %v3805_v24, %v2997_v35  ;;  %v1472_v24 = vmul.f32 %v3583_v29, %v4745_v27 }
 0x3d0   : > { %4766 = vst [vmem:[#allocation80_spill] sm:$0xff] %v4017_v53  ;;  %v4025_v20 = vadd.f32 %v1400_v9, %v1222_v15  ;;  %v4027_v31 = vpop.permute.xlu1 %1740  ;;  %1766 = vrot.lane.b32.xlu0 %v1702_v52, %s2664_s10  ;;  %v382_v52 = vmul.f32 %v4769_v17, %v2953_v2  ;;  %v4772_v9 = vld [vmem:[#allocation23_spill] sm:$0xff]  ;;  %v4780_v53 = vld [vmem:[#allocation40_spill] sm:$0xff]  ;;  %v1476_v27 = vmul.f32 %v3541_v48, %v4746_v7 }
 0x3d1   : > { %4768 = vst [vmem:[#allocation79_spill] sm:$0xff] %v4027_v31  ;;  %v436_v1 = vmul.f32 %v4771_v8, %v380_v22  ;;  %v4775_v22 = vld [vmem:[#allocation25_spill] sm:$0xff] }
 0x3d2   : > { %4767 = vst [vmem:[#allocation84_spill] sm:$0xff] %v4025_v20  ;;  %1389 = vrot.lane.b32.xlu1 %v1320_v12, %s2662_s12  ;;  %v4034_v10 = vpop.permute.xlu0 %1734  ;;  %v4773_v12 = vld [vmem:[#allocation20_spill] sm:$0xff]  ;;  %v1532_v48 = vmul.f32 %v3833_v62, %v1476_v27 }
 0x3d3   : > { %4770 = vst [vmem:[#allocation78_spill] sm:$0xff] %v4034_v10  ;;  %v581_v50 = vsel %vm579_vm2, %v4773_v12, %v4772_v9  ;;  %v4777_v10 = vld [vmem:[#allocation61_spill] sm:$0xff]  ;;  %v4779_v9 = vld [vmem:[#allocation8_spill] sm:$0xff] }
 0x3d4   : > { %v1166_v15 = vpop.permute.xlu1 %1165  ;;  %1383 = vrot.lane.b32.xlu0 %v1317_v21, %s2662_s12  ;;  %v583_v21 = vsel %vm579_vm2, %v4775_v22, %v4774_v46  ;;  %v613_v20 = vadd.f32 %v581_v50, %v436_v1  ;;  %v438_v17 = vmul.f32 %v4779_v9, %v382_v52  ;;  %v802_v46 = vsel %vm798_vm3, %v4781_v58, %v4780_v53  ;;  %v4784_v50 = vld [vmem:[#allocation36_spill] sm:$0xff] }
 0x3d6   : > { %1764 = vrot.lane.b32.xlu1 %v1701_v57, %s2664_s10  ;;  %v4045_v23 = vpop.permute.xlu0 %1163  ;;  %v4776_v57 = vld [vmem:[#allocation82_spill] sm:$0xff] }
 0x3d7   : > { %v1195_v59 = vsel %vm1185_vm9, %v4045_v23, %v1166_v15  ;;  %v1529_v13 = vmul.f32 %v4776_v57, %v1473_v14  ;;  %v1528_v15 = vmul.f32 %v4776_v57, %v1472_v24  ;;  %v615_v14 = vadd.f32 %v583_v21, %v438_v17  ;;  %v4786_v17 = vld [vmem:[#allocation22_spill] sm:$0xff] }
 0x3d8   : > { %v4061_v31 = vadd.f32 %v1195_v59, %v4777_v10  ;;  %v1172_v2 = vpop.permute.xlu1 %1171  ;;  %1758 = vrot.lane.b32.xlu0 %v1698_v56, %s2664_s10  ;;  %v4782_v59 = vld [vmem:[#allocation18_spill] sm:$0xff]  ;;  %v4783_v56 = vld [vmem:[#allocation37_spill] sm:$0xff]  ;;  %v1475_v24 = vmul.f32 %v3583_v29, %v4749_v26  ;;  %v582_v21 = vsel %vm579_vm2, %v4786_v17, %v4775_v22 }
 0x3d9   : > { %v381_v10 = vmul.f32 %v4782_v59, %v2943_v61  ;;  %v800_v52 = vsel %vm798_vm3, %v4784_v50, %v4783_v56  ;;  %v834_v56 = vadd.f32 %v802_v46, %v615_v14  ;;  %v4788_v29 = vld [vmem:[#allocation54_spill] sm:$0xff]  ;;  %v4790_v22 = vld [vmem:[#allocation49_spill] sm:$0xff] }
 0x3da   : > { %4778 = vst [vmem:[#allocation14_spill] sm:$0xff] %v4061_v31  ;;  %1597 = vrot.lane.b32.xlu1 %v1529_v13, %s2663_s9  ;;  %v4072_v1 = vpop.permute.xlu0 %1169  ;;  %v832_v31 = vadd.f32 %v800_v52, %v613_v20  ;;  %v379_v20 = vmul.f32 %v4782_v59, %v2933_v55  ;;  %v1854_v52 = vmul.f32 %v3723_v38, %v3005_v40  ;;  %v4792_v55 = vld [vmem:[#allocation71_spill] sm:$0xff] }
 0x3db   : > { %v1197_v53 = vsel %vm1185_vm9, %v4072_v1, %v1172_v2  ;;  %v437_v61 = vmul.f32 %v4779_v9, %v381_v10  ;;  %v4787_v2 = vld [vmem:[#allocation53_spill] sm:$0xff]  ;;  %v4791_v10 = vld [vmem:[#allocation70_spill] sm:$0xff]  ;;  %v1853_v40 = vmul.f32 %v3740_v6, %v2994_v34 }
 0x3dc   : > { %v4085_v13 = vadd.f32 %v1197_v53, %v3742_v54  ;;  %v1574_v7 = vpop.permute.xlu1 %1573  ;;  %1595 = vrot.lane.b32.xlu0 %v1528_v15, %s2663_s9  ;;  %v1012_v27 = vsel %vm1008_vm5, %v4788_v29, %v4787_v2  ;;  %v1531_v54 = vmul.f32 %v3833_v62, %v1475_v24  ;;  %v4789_v15 = vld [vmem:[#allocation52_spill] sm:$0xff]  ;;  %v1189_v59 = vsel %vm1185_vm9, %v4792_v55, %v4791_v10 }
 0x3dd   : > { %v1010_v46 = vsel %vm1008_vm5, %v4790_v22, %v4789_v15  ;;  %v435_v14 = vmul.f32 %v4771_v8, %v379_v20  ;;  %v1910_v24 = vmul.f32 %v3843_v49, %v1854_v52  ;;  %v1857_v2 = vmul.f32 %v3723_v38, %v3017_v47  ;;  %v4794_v15 = vld [vmem:[#allocation21_spill] sm:$0xff] }
 0x3de   : > { %4785 = vst [vmem:[#allocation65_spill] sm:$0xff] %v4085_v13  ;;  %1603 = vrot.lane.b32.xlu1 %v1532_v48, %s2663_s9  ;;  %v4101_v9 = vpop.permute.xlu0 %1571  ;;  %v1042_v48 = vadd.f32 %v1010_v46, %v832_v31  ;;  %v580_v8 = vsel %vm579_vm2, %v4794_v15, %v4773_v12  ;;  %v1044_v20 = vadd.f32 %v1012_v27, %v834_v56 }
 0x3df   : > { %v4112_v53 = vsel %vm1605_vm11, %v4101_v9, %v1574_v7  ;;  %v614_v10 = vadd.f32 %v582_v21, %v437_v61  ;;  %v4795_v7 = vld [vmem:[#allocation69_spill] sm:$0xff]  ;;  %v1909_v34 = vmul.f32 %v3843_v49, %v1853_v40  ;;  %v1397_v12 = vsel %vm1395_vm10, %v3892_v36, %v3889_v11 }
 0x3e0   : > { %4793 = vst [vmem:[#allocation64_spill] sm:$0xff] %v4112_v53  ;;  %v1580_v17 = vpop.permute.xlu1 %1579  ;;  %1601 = vrot.lane.b32.xlu0 %v1531_v54, %s2663_s9  ;;  %v4796_v53 = vld [vmem:[#allocation66_spill] sm:$0xff]  ;;  %v1856_v54 = vmul.f32 %v3740_v6, %v3022_v39  ;;  %v1221_v47 = vadd.f32 %v1189_v59, %v1044_v20  ;;  %v1399_v61 = vsel %vm1395_vm10, %v3906_v33, %v3901_v0  ;;  %v4797_v39 = vld [vmem:[#allocation85_spill] sm:$0xff] }
 0x3e1   : > { %v1187_v13 = vsel %vm1185_vm9, %v4796_v53, %v4795_v7  ;;  %v612_v56 = vadd.f32 %v580_v8, %v435_v14  ;;  %v1913_v46 = vmul.f32 %v4797_v39, %v1857_v2  ;;  %v4798_v59 = vld [vmem:[#allocation38_spill] sm:$0xff]  ;;  %v1474_v40 = vmul.f32 %v3577_v30, %v4753_v16 }
 0x3e2   : > { %1972 = vrot.lane.b32.xlu1 %v1910_v24, %s2665_s11  ;;  %v4128_v31 = vpop.permute.xlu0 %1577  ;;  %v1219_v27 = vadd.f32 %v1187_v13, %v1042_v48  ;;  %v801_v11 = vsel %vm798_vm3, %v4798_v59, %v4781_v58  ;;  %v1607_v0 = vsel %vm1605_vm11, %v3930_v41, %v3925_v3  ;;  %v1609_v13 = vsel %vm1605_vm11, %v3942_v43, %v3934_v37 }
 0x3e3   : > { %v4140_v21 = vsel %vm1605_vm11, %v4128_v31, %v1580_v17  ;;  %v1431_v24 = vadd.f32 %v1399_v61, %v1221_v47  ;;  %v1912_v58 = vmul.f32 %v4797_v39, %v1856_v54  ;;  %v4799_v17 = vld [vmem:[#allocation35_spill] sm:$0xff]  ;;  %v1471_v3 = vmul.f32 %v3577_v30, %v4754_v19 }
 0x3e4   : > { %v1949_v52 = vpop.permute.xlu1 %1948  ;;  %1970 = vrot.lane.b32.xlu0 %v1909_v34, %s2665_s11  ;;  %v1429_v14 = vadd.f32 %v1397_v12, %v1219_v27  ;;  %v799_v2 = vsel %vm798_vm3, %v4799_v17, %v4784_v50  ;;  %v1784_v37 = vsel %vm1782_vm12, %v3988_v18, %v3983_v63  ;;  %v1786_v15 = vsel %vm1782_vm12, %v3998_v28, %v3992_v5  ;;  %v4800_v47 = vld [vmem:[#allocation51_spill] sm:$0xff]  ;;  %v4801_v27 = vld [vmem:[#allocation50_spill] sm:$0xff] }
 0x3e5   : > { %v831_v8 = vadd.f32 %v799_v2, %v612_v56  ;;  %v1530_v20 = vmul.f32 %v3833_v62, %v1474_v40  ;;  %v1641_v34 = vadd.f32 %v1609_v13, %v1431_v24  ;;  %v833_v50 = vadd.f32 %v801_v11, %v614_v10 }
 0x3e6   : > { %1978 = vrot.lane.b32.xlu1 %v1913_v46, %s2665_s11  ;;  %v4156_v48 = vpop.permute.xlu0 %1946  ;;  %v1639_v7 = vadd.f32 %v1607_v0, %v1429_v14  ;;  %v1011_v30 = vsel %vm1008_vm5, %v4800_v47, %v4788_v29  ;;  %v1527_v12 = vmul.f32 %v4776_v57, %v1471_v3  ;;  %v1855_v5 = vmul.f32 %v3589_v25, %v3009_v42  ;;  %v4802_v46 = vld [vmem:[#allocation68_spill] sm:$0xff]  ;;  %v4803_v14 = vld [vmem:[#allocation67_spill] sm:$0xff] }
 0x3e7   : > { %v1994_v63 = vsel %vm1992_vm13, %v4156_v48, %v1949_v52  ;;  %v1818_v62 = vadd.f32 %v1786_v15, %v1641_v34  ;;  %v1009_v10 = vsel %vm1008_vm5, %v4801_v27, %v4790_v22  ;;  %v1188_v29 = vsel %vm1185_vm9, %v4802_v46, %v4792_v55  ;;  %v4804_v3 = vld [vmem:[#allocation60_spill] sm:$0xff] }
 0x3e8   : > { %v1955_v54 = vpop.permute.xlu1 %1954  ;;  %1976 = vrot.lane.b32.xlu0 %v1912_v58, %s2665_s11  ;;  %v1816_v61 = vadd.f32 %v1784_v37, %v1639_v7  ;;  %v1852_v52 = vmul.f32 %v3589_v25, %v2997_v35  ;;  %v1911_v42 = vmul.f32 %v4797_v39, %v1855_v5  ;;  %v1041_v59 = vadd.f32 %v1009_v10, %v831_v8  ;;  %v4807_v34 = vld [vmem:[#allocation80_spill] sm:$0xff] }
 0x3e9   : > { %v1043_v13 = vadd.f32 %v1011_v30, %v833_v50  ;;  %v1186_v55 = vsel %vm1185_vm9, %v4803_v14, %v4796_v53  ;;  %v1398_v2 = vsel %vm1395_vm10, %v3912_v51, %v3906_v33  ;;  %v1608_v33 = vsel %vm1605_vm11, %v3947_v44, %v3942_v43  ;;  %v4808_v43 = vld [vmem:[#allocation79_spill] sm:$0xff]  ;;  %v4810_v30 = vld [vmem:[#allocation16_spill] sm:$0xff]  ;;  %v4813_v14 = vld [vmem:[#allocation14_spill] sm:$0xff] }
 0x3ea   : > { %1599 = vrot.lane.b32.xlu1 %v1530_v20, %s2663_s9  ;;  %v1953_v56 = vpop.permute.xlu0 %1952  ;;  %v2026_v11 = vadd.f32 %v1994_v63, %v1816_v61  ;;  %v1908_v35 = vmul.f32 %v3843_v49, %v1852_v52  ;;  %v1218_v49 = vadd.f32 %v1186_v55, %v1041_v59  ;;  %v1785_v44 = vsel %vm1782_vm12, %v4808_v43, %v3998_v28  ;;  %v4811_v63 = vld [vmem:[#allocation34_spill] sm:$0xff]  ;;  %v2060_v43 = vld [vmem:[%s4560_s3 + $0x18] sm:$0xff] }
 0x3eb   : > { %v1996_v57 = vsel %vm1992_vm13, %v1953_v56, %v1955_v54  ;;  %v1220_v17 = vadd.f32 %v1188_v29, %v1043_v13  ;;  %v1708_v46 = vmul.f32 %v4811_v63, %v4749_v26 }
 0x3ec   : > { %v2028_v40 = vadd.f32 %v1996_v57, %v1818_v62  ;;  %v1168_v0 = vpop.permute.xlu1 %1167  ;;  %1593 = vrot.lane.b32.xlu0 %v1527_v12, %s2663_s9  ;;  %v1709_v12 = vmul.f32 %v4811_v63, %v4810_v30  ;;  %v4812_v62 = vld [vmem:[#allocation84_spill] sm:$0xff]  ;;  %v1707_v57 = vmul.f32 %v4811_v63, %v4753_v16 }
 0x3ed   : > { %v1196_v22 = vsel %vm1185_vm9, %v1168_v0, %v4072_v1  ;;  %v1396_v1 = vsel %vm1395_vm10, %v3916_v60, %v3892_v36  ;;  %v4805_v36 = vld [vmem:[#allocation46_spill] sm:$0xff]  ;;  %v1430_v20 = vadd.f32 %v1398_v2, %v1220_v17 }
 0x3ee   : > { %v4199_v24 = vadd.f32 %v1196_v22, %v3769_v45  ;;  %1974 = vrot.lane.b32.xlu1 %v1911_v42, %s2665_s11  ;;  %v1162_v39 = vpop.permute.xlu0 %1161  ;;  %v2050_v58 = vpack.c.bf16 %v2028_v40, %v2026_v11  ;;  %v1706_v45 = vmul.f32 %v3857_v4, %v4743_v32  ;;  %v1606_v51 = vsel %vm1605_vm11, %v4805_v36, %v3930_v41  ;;  %v4809_v41 = vld [vmem:[#allocation78_spill] sm:$0xff] }
 0x3ef   : > { %v1194_v53 = vsel %vm1185_vm9, %v1162_v39, %v4045_v23  ;;  %v4806_v23 = vld [vmem:[#allocation12_spill] sm:$0xff]  ;;  %v1428_v7 = vadd.f32 %v1396_v1, %v1218_v49  ;;  %v1640_v5 = vadd.f32 %v1608_v33, %v1430_v20  ;;  %v1704_v40 = vmul.f32 %v3857_v4, %v4754_v19  ;;  %v4816_v49 = vld [vmem:[#allocation65_spill] sm:$0xff] }
 0x3f0   : > { %v4213_v37 = vadd.f32 %v1194_v53, %v4804_v3  ;;  %v1576_v15 = vpop.permute.xlu1 %1575  ;;  %1968 = vrot.lane.b32.xlu0 %v1908_v35, %s2665_s11  ;;  %2138 = vmatprep.subr.bf16.mxu0 %v2050_v58  ;;  %v1705_v8 = vmul.f32 %v3857_v4, %v4806_v23  ;;  %v1863_v4 = vmul.f32 %v3723_v38, %v4810_v30  ;;  %v4815_v53 = vld [vmem:[#allocation32_spill] sm:$0xff] }
 0x3f1   : > { %v1612_v60 = vsel %vm1605_vm11, %v1576_v15, %v4128_v31  ;;  %2419 = vmatprep.subr.bf16.mxu1 %v2050_v58  ;;  %v1783_v31 = vsel %vm1782_vm12, %v4809_v41, %v3988_v18  ;;  %v1638_v61 = vadd.f32 %v1606_v51, %v1428_v7  ;;  %v1817_v18 = vadd.f32 %v1785_v44, %v1640_v5  ;;  %v4817_v44 = vld [vmem:[#allocation11_spill] sm:$0xff]  ;;  %v4820_v5 = vld [vmem:[#allocation28_spill] sm:$0xff] }
 0x3f2   : > { %v4227_v54 = vadd.f32 %v1612_v60, %v4807_v34  ;;  %1774 = vrot.lane.b32.xlu1 %v1706_v45, %s2664_s10  ;;  %v1570_v50 = vpop.permute.xlu0 %1569  ;;  %v1862_v1 = vmul.f32 %v3740_v6, %v4749_v26  ;;  %v1919_v45 = vmul.f32 %v4815_v53, %v1863_v4  ;;  %v4818_v41 = vld [vmem:[#allocation19_spill] sm:$0xff] }
 0x3f3   : > { %v1610_v47 = vsel %vm1605_vm11, %v1570_v50, %v4101_v9  ;;  %v1815_v29 = vadd.f32 %v1783_v31, %v1638_v61  ;;  %v386_v31 = vmul.f32 %v4818_v41, %v4817_v44  ;;  %v4821_v61 = vld [vmem:[#allocation29_spill] sm:$0xff] }
 0x3f4   : > { %v4241_v27 = vadd.f32 %v1610_v47, %v4812_v62  ;;  %v1951_v10 = vpop.permute.xlu1 %1950  ;;  %1772 = vrot.lane.b32.xlu0 %v1705_v8, %s2664_s10  ;;  %v1918_v33 = vmul.f32 %v4815_v53, %v1862_v1  ;;  %v587_v62 = vsel %vm579_vm2, %v4821_v61, %v4820_v5  ;;  %v4840_v5 = vld [vmem:[#allocation33_spill] sm:$0xff] }
 0x3f5   : > { %v1995_v28 = vsel %vm1992_vm13, %v1951_v10, %v1953_v56  ;;  %v1860_v56 = vmul.f32 %v3723_v38, %v4743_v32  ;;  %v4814_v32 = vld [vmem:[#allocation86_spill] sm:$0xff]  ;;  %v1861_v38 = vmul.f32 %v3589_v25, %v4753_v16  ;;  %v4841_v61 = vld [vmem:[#allocation45_spill] sm:$0xff] }
 0x3f6   : > { %1780 = vrot.lane.b32.xlu1 %v1709_v12, %s2664_s10  ;;  %v1945_v9 = vpop.permute.xlu0 %1944  ;;  %v2027_v42 = vadd.f32 %v1995_v28, %v1817_v18 }
 0x3f7   : > { %v1993_v52 = vsel %vm1992_vm13, %v1945_v9, %v4156_v48  ;;  %v1859_v48 = vmul.f32 %v3740_v6, %v4806_v23  ;;  %v1916_v39 = vmul.f32 %v4814_v32, %v1860_v56  ;;  %v1858_v6 = vmul.f32 %v3589_v25, %v4754_v19  ;;  %v2057_v25 = vld [vmem:[%s4560_s3] sm:$0xff]  ;;  %v2064_v9 = vld [vmem:[%s4560_s3 + $0x38] sm:$0xff] }
 0x3f8   : > { %v2025_v59 = vadd.f32 %v1993_v52, %v1815_v29  ;;  %v1376_v11 = vpop.permute.xlu1 %1375  ;;  %1778 = vrot.lane.b32.xlu0 %v1708_v46, %s2664_s10  ;;  %v1917_v26 = vmul.f32 %v4815_v53, %v1861_v38  ;;  %v4822_v46 = vld [vmem:[#allocation63_spill] sm:$0xff]  ;;  %v4823_v52 = vld [vmem:[#allocation10_spill] sm:$0xff]  ;;  %v4832_v38 = vld [vmem:[#allocation57_spill] sm:$0xff] }
 0x3f9   : > { %v1915_v17 = vmul.f32 %v4814_v32, %v1859_v48  ;;  %v1914_v60 = vmul.f32 %v4814_v32, %v1858_v6  ;;  %v2059_v53 = vld [vmem:[%s4560_s3 + $0x10] sm:$0xff] }
 0x3fa   : > { %1776 = vrot.lane.b32.xlu1 %v1707_v57, %s2664_s10  ;;  %v1374_v0 = vpop.permute.xlu0 %1373  ;;  %v2049_v13 = vpack.c.bf16 %v2027_v42, %v2025_v59  ;;  %v384_v57 = vmul.f32 %v4818_v41, %v4823_v52  ;;  %v4824_v59 = vld [vmem:[#allocation27_spill] sm:$0xff]  ;;  %v2061_v41 = vld [vmem:[%s4560_s3 + $0x20] sm:$0xff] }
 0x3fb   : > { %v1405_v22 = vsel %vm1395_vm10, %v1374_v0, %v1376_v11  ;;  %v4825_v11 = vld [vmem:[#allocation26_spill] sm:$0xff] }
 0x3fc   : > { %v4262_v55 = vadd.f32 %v1405_v22, %v4813_v14  ;;  %v1382_v35 = vpop.permute.xlu1 %1381  ;;  %1770 = vrot.lane.b32.xlu0 %v1704_v40, %s2664_s10  ;;  %2139 = vmatpush1.bf16.msra.mxu0 %v2049_v13  ;;  %v585_v56 = vsel %vm579_vm2, %v4825_v11, %v4824_v59  ;;  %v4826_v40 = vld [vmem:[#allocation44_spill] sm:$0xff]  ;;  %v2058_v22 = vld [vmem:[%s4560_s3 + $0x8] sm:$0xff]  ;;  %s4483_s10 = scalar_lea.vmem [#allocation5], %s2401_s25  ;;  %s2418_s25 = sshll.u32 %s2719_s22, 11 }
 0x3fd   : > { %2423 = vmatpush1.bf16.msra.mxu1 %v2049_v13  ;;  %v4828_v14 = vld [vmem:[#allocation9_spill] sm:$0xff]  ;;  %s4504_s17 = scalar_lea.hbm %s4562_s5, %s2418_s25 }
 0x3fe   : > { %1984 = vrot.lane.b32.xlu1 %v1916_v39, %s2665_s11  ;;  %v1380_v58 = vpop.permute.xlu0 %1379  ;;  %v4829_v39 = vld [vmem:[#allocation31_spill] sm:$0xff] }
 0x3ff   : > { %v1407_v2 = vsel %vm1395_vm10, %v1380_v58, %v1382_v35  ;;  %v440_v35 = vmul.f32 %v4828_v14, %v384_v57  ;;  %v2063_v57 = vld [vmem:[%s4560_s3 + $0x30] sm:$0xff] }
 0x400   : > { %v4275_v3 = vadd.f32 %v1407_v2, %v4816_v49  ;;  %v4277_v15 = vpop.permute.xlu1 %1750  ;;  %1982 = vrot.lane.b32.xlu0 %v1915_v17, %s2665_s11  ;;  %v4830_v17 = vld [vmem:[#allocation42_spill] sm:$0xff]  ;;  %v4831_v2 = vld [vmem:[#allocation41_spill] sm:$0xff] }
 0x401   : > { %v804_v1 = vsel %vm798_vm3, %v4831_v2, %v4830_v17 }
 0x402   : > { %1990 = vrot.lane.b32.xlu1 %v1919_v45, %s2665_s11  ;;  %v4284_v36 = vpop.permute.xlu0 %1748  ;;  %v617_v45 = vadd.f32 %v585_v56, %v440_v35 }
 0x404   : > { %v4289_v51 = vpop.permute.xlu1 %1756  ;;  %1988 = vrot.lane.b32.xlu0 %v1918_v33, %s2665_s11  ;;  %v4833_v33 = vld [vmem:[#allocation55_spill] sm:$0xff] }
 0x405   : > { %v1014_v6 = vsel %vm1008_vm5, %v4833_v33, %v4832_v38  ;;  %v4845_v38 = vld [vmem:[#allocation30_spill] sm:$0xff] }
 0x406   : > { %1986 = vrot.lane.b32.xlu1 %v1917_v26, %s2665_s11  ;;  %v4294_v16 = vpop.permute.xlu0 %1754  ;;  %v4834_v26 = vld [vmem:[#allocation58_spill] sm:$0xff] }
 0x408   : > { %v1378_v23 = vpop.permute.xlu1 %1377  ;;  %1980 = vrot.lane.b32.xlu0 %v1914_v60, %s2665_s11  ;;  %v4835_v60 = vld [vmem:[#allocation59_spill] sm:$0xff]  ;;  %s2321_s11 = sshll.u32 %s4483_s10, 4  ;;  %s4508_s11 = int_to_ptr.vmem [resolvable:$true] %s2321_s11 }
 0x409   : > { %v1406_v8 = vsel %vm1395_vm10, %v1378_v23, %v1380_v58  ;;  %v1016_v23 = vsel %vm1008_vm5, %v4835_v60, %v4834_v26  ;;  %v4846_v26 = vld [vmem:[#allocation62_spill] sm:$0xff]  ;;  %s2572_s29 = scalar_lea.vmem %s4508_s11, 2048  ;;  %p2579_p8 = scmp.lt.s32.totalorder %s4508_s11, %s2577_s15 }
 0x40a   : > { %v4302_v19 = vadd.f32 %v1406_v8, %v4199_v24  ;;  %v1372_v20 = vpop.permute.xlu0 %1371  ;;  %v4819_v24 = vld [vmem:[#allocation89_spill] sm:$0xff]  ;;  %2072 = vperm.xlu1 %2529, %v2058_v22   ;;  %v836_v8 = vadd.f32 %v804_v1, %v617_v45  ;;  %p2573_p6 = scmp.ne.s32.totalorder %s4508_s11, %s2572_s29  ;;  %p2580_p10 = scmp.lt.s32.totalorder %s2578_s16, %s2572_s29 }
 0x40b   : > { %v1404_v7 = vsel %vm1395_vm10, %v1372_v20, %v1374_v0  ;;  %v442_v30 = vmul.f32 %v4819_v24, %v386_v31  ;;  %v4827_v0 = vld [vmem:[#allocation43_spill] sm:$0xff] }
 0x40c   : > { %v4306_v34 = vadd.f32 %v1404_v7, %v4213_v37  ;;  %v4308_v50 = vpop.permute.xlu1 %1752  ;;  %2067 = vperm.xlu0 %2527, %v2057_v25   ;;  %v2062_v37 = vld [vmem:[%s4560_s3 + $0x28] sm:$0xff]  ;;  %v806_v13 = vsel %vm798_vm3, %v4827_v0, %v4826_v40  ;;  %v4836_v7 = vld [vmem:[#allocation75_spill] sm:$0xff]  ;;  %v1046_v31 = vadd.f32 %v1014_v6, %v836_v8  ;;  %v1788_v40 = vsel %vm1782_vm12, %v4284_v36, %v4277_v15  ;;  %p2574_p12 = pnand %p2573_p6, %p4848_p11  ;;  %p2581_p0 = por %p2580_p10, %p2579_p8 }
 0x40d   : > { %v619_v28 = vadd.f32 %v587_v62, %v442_v30  ;;  %v4838_v30 = vld [vmem:[#allocation76_spill] sm:$0xff]  ;;  %v1401_v62 = vsel %vm1395_vm10, %v4841_v61, %v4840_v5  ;;  %v1790_v0 = vsel %vm1782_vm12, %v4294_v16, %v4289_v51 }
 0x40e   : > { %v4315_v47 = vpop.permute.xlu0 %1746  ;;  %2077 = vperm.xlu1 %2529, %v2059_v53   ;;  %p2575_p13 = pneg %p2574_p12 }
 0x40f   : > { %v838_v32 = vadd.f32 %v806_v13, %v619_v28  ;;  %v4843_v28 = vld [vmem:[#allocation48_spill] sm:$0xff] }
 0x410   : > { %v1178_v63 = vpop.permute.xlu1 %1177  ;;  %2082 = vperm.xlu0 %2527, %v2060_v43   ;;  %v4837_v43 = vld [vmem:[#allocation72_spill] sm:$0xff]  ;;  %p2582_p2 = pnand %p2581_p0, %p2575_p13 }
 0x411   : > { %v1048_v25 = vadd.f32 %v1016_v23, %v838_v32  ;;  %v1191_v44 = vsel %vm1185_vm9, %v4837_v43, %v4836_v7  ;;  %v4844_v13 = vld [vmem:[#allocation64_spill] sm:$0xff]  ;;  %v1789_v7 = vsel %vm1782_vm12, %v4308_v50, %v4294_v16 }
 0x412   : > { %v4321_v12 = vpop.permute.xlu0 %1175  ;;  %2087 = vperm.xlu1 %2529, %v2061_v41  }
 0x413   : > { %v1199_v10 = vsel %vm1185_vm9, %v4321_v12, %v1178_v63  ;;  %v4839_v63 = vld [vmem:[#allocation77_spill] sm:$0xff] }
 0x414   : > { %v4329_v18 = vadd.f32 %v1199_v10, %v4822_v46  ;;  %v1184_v29 = vpop.permute.xlu1 %1183  ;;  %2092 = vperm.xlu0 %2527, %v2062_v37   ;;  %v1193_v37 = vsel %vm1185_vm9, %v4839_v63, %v4838_v30  ;;  %v4842_v10 = vld [vmem:[#allocation47_spill] sm:$0xff]  ;;  %v1821_v30 = vadd.f32 %v1789_v7, %v4227_v54 }
 0x415   : > { %v1403_v46 = vsel %vm1395_vm10, %v4843_v28, %v4842_v10 }
 0x416   : > { %v1182_v42 = vpop.permute.xlu0 %1181  ;;  %2097 = vperm.xlu1 %2529, %v2063_v57  }
 0x417   : > { %v1201_v48 = vsel %vm1185_vm9, %v1182_v42, %v1184_v29  ;;  %v1223_v29 = vadd.f32 %v1191_v44, %v1046_v31 }
 0x418   : > { %v4348_v4 = vadd.f32 %v1201_v48, %v4829_v39  ;;  %v4350_v58 = vpop.permute.xlu1 %1585  ;;  %2102 = vperm.xlu0 %2527, %v2064_v9   ;;  %v1225_v9 = vadd.f32 %v1193_v37, %v1048_v25 }
 0x419   : > { %v1433_v59 = vadd.f32 %v1401_v62, %v1223_v29 }
 0x41a   : > { %v4358_v49 = vpop.permute.xlu0 %1583  ;;  %v1435_v11 = vadd.f32 %v1403_v46, %v1225_v9 }
 0x41b   : > { %v1643_v48 = vadd.f32 %v4844_v13, %v1433_v59 }
 0x41c   : > { %v4366_v20 = vpop.permute.xlu1 %1591  ;;  %v1645_v22 = vadd.f32 %v4140_v21, %v1435_v11 }
 0x41d   : > { %v1820_v32 = vadd.f32 %v1788_v40, %v1643_v48  ;;  %v1615_v40 = vsel %vm1605_vm11, %v4358_v49, %v4350_v58 }
 0x41e   : > { %v4374_v24 = vpop.permute.xlu0 %1589  ;;  %v1822_v39 = vadd.f32 %v1790_v0, %v1645_v22 }
 0x41f   : > { %v1617_v0 = vsel %vm1605_vm11, %v4374_v24, %v4366_v20 }
 0x420   : > { %v1961_v52 = vpop.permute.xlu1 %1960 }
 0x422   : > { %v1959_v56 = vpop.permute.xlu0 %1958 }
 0x423   : > { %v1998_v35 = vsel %vm1992_vm13, %v1959_v56, %v1961_v52 }
 0x424   : > { %v1967_v14 = vpop.permute.xlu1 %1966  ;;  %v2030_v1 = vadd.f32 %v1998_v35, %v1820_v32  ;;  %v1649_v35 = vadd.f32 %v1617_v0, %v4275_v3 }
 0x426   : > { %v1965_v17 = vpop.permute.xlu0 %1964 }
 0x427   : > { %v2000_v2 = vsel %vm1992_vm13, %v1965_v17, %v1967_v14  ;;  %v1647_v14 = vadd.f32 %v1615_v40, %v4262_v55 }
 0x428   : > { %v2032_v53 = vadd.f32 %v2000_v2, %v1822_v39  ;;  %v1180_v15 = vpop.permute.xlu1 %1179 }
 0x429   : > { %v1200_v45 = vsel %vm1185_vm9, %v1180_v15, %v1182_v42 }
 0x42a   : > { %v4400_v51 = vadd.f32 %v1200_v45, %v4845_v38  ;;  %v1174_v33 = vpop.permute.xlu0 %1173  ;;  %v2052_v6 = vpack.c.bf16 %v2032_v53, %v2030_v1 }
 0x42b   : > { %v1198_v21 = vsel %vm1185_vm9, %v1174_v33, %v4321_v12  ;;  %v1787_v12 = vsel %vm1782_vm12, %v4315_v47, %v4284_v36 }
 0x42c   : > { %v4405_v60 = vadd.f32 %v1198_v21, %v4846_v26  ;;  %v1588_v23 = vpop.permute.xlu1 %1587  ;;  %2140 = vmatprep.subr.bf16.mxu0 %v2052_v6  ;;  %2420 = vmatprep.subr.bf16.mxu1 %v2052_v6 }
 0x42d   : > { %v1616_v8 = vsel %vm1605_vm11, %v1588_v23, %v4374_v24 }
 0x42e   : > { %v1648_v25 = vadd.f32 %v1616_v8, %v4302_v19  ;;  %v1582_v42 = vpop.permute.xlu0 %1581  ;;  %v1819_v19 = vadd.f32 %v1787_v12, %v4241_v27 }
 0x42f   : > { %v1614_v43 = vsel %vm1605_vm11, %v1582_v42, %v4358_v49 }
 0x430   : > { %v1646_v44 = vadd.f32 %v1614_v43, %v4306_v34  ;;  %v1963_v41 = vpop.permute.xlu1 %1962 }
 0x431   : > { %v1999_v31 = vsel %vm1992_vm13, %v1963_v41, %v1965_v17 }
 0x432   : > { %v1957_v63 = vpop.permute.xlu0 %1956  ;;  %v2031_v16 = vadd.f32 %v1999_v31, %v1821_v30 }
 0x433   : > { %v1997_v37 = vsel %vm1992_vm13, %v1957_v63, %v1959_v56 }
 0x434   : > { %v2029_v50 = vadd.f32 %v1997_v37, %v1819_v19  ;;  %v1388_v5 = vpop.permute.xlu1 %1387 }
 0x436   : > { %v4423_v61 = vpop.permute.xlu0 %1385  ;;  %v2051_v36 = vpack.c.bf16 %v2031_v16, %v2029_v50 }
 0x437   : > { %v1409_v19 = vsel %vm1395_vm10, %v4423_v61, %v1388_v5 }
 0x438   : > { %v1394_v47 = vpop.permute.xlu1 %1393  ;;  %2141 = vmatpush1.bf16.msra.mxu0 %v2051_v36  ;;  %2424 = vmatpush1.bf16.msra.mxu1 %v2051_v36  ;;  %v1441_v16 = vadd.f32 %v1409_v19, %v4329_v18 }
 0x43a   : > { %v1392_v34 = vpop.permute.xlu0 %1391 }
 0x43c   : > { %v1763_v62 = vpop.permute.xlu1 %1762 }
 0x43e   : > { %v1761_v10 = vpop.permute.xlu0 %1760 }
 0x43f   : > { %v1792_v48 = vsel %vm1782_vm12, %v1761_v10, %v1763_v62 }
 0x440   : > { %v1769_v28 = vpop.permute.xlu1 %1768  ;;  %v1824_v17 = vadd.f32 %v1792_v48, %v1647_v14 }
 0x442   : > { %v1767_v46 = vpop.permute.xlu0 %1766 }
 0x443   : > { %v1794_v22 = vsel %vm1782_vm12, %v1767_v46, %v1769_v28 }
 0x444   : > { %v1390_v54 = vpop.permute.xlu1 %1389  ;;  %v1826_v2 = vadd.f32 %v1794_v22, %v1649_v35 }
 0x445   : > { %v1410_v62 = vsel %vm1395_vm10, %v1390_v54, %v1392_v34 }
 0x446   : > { %v1384_v29 = vpop.permute.xlu0 %1383 }
 0x448   : > { %v1765_v27 = vpop.permute.xlu1 %1764 }
 0x449   : > { %v1793_v45 = vsel %vm1782_vm12, %v1765_v27, %v1767_v46 }
 0x44a   : > { %v1759_v9 = vpop.permute.xlu0 %1758  ;;  %v1825_v33 = vadd.f32 %v1793_v45, %v1648_v25  ;;  %v1411_v25 = vsel %vm1395_vm10, %v1392_v34, %v1394_v47 }
 0x44b   : > { %v1791_v38 = vsel %vm1782_vm12, %v1759_v9, %v1761_v10  ;;  %v1443_v50 = vadd.f32 %v1411_v25, %v4348_v4  ;;  %v1408_v10 = vsel %vm1395_vm10, %v1384_v29, %v4423_v61  ;;  %v1442_v4 = vadd.f32 %v1410_v62, %v4400_v51 }
 0x44c   : > { %v1598_v52 = vpop.permute.xlu1 %1597  ;;  %v1823_v6 = vadd.f32 %v1791_v38, %v1646_v44  ;;  %v1440_v34 = vadd.f32 %v1408_v10, %v4405_v60 }
 0x44e   : > { %v1596_v57 = vpop.permute.xlu0 %1595 }
 0x44f   : > { %v1619_v63 = vsel %vm1605_vm11, %v1596_v57, %v1598_v52 }
 0x450   : > { %v1604_v59 = vpop.permute.xlu1 %1603  ;;  %v1651_v47 = vadd.f32 %v1619_v63, %v1441_v16 }
 0x452   : > { %v1602_v11 = vpop.permute.xlu0 %1601 }
 0x453   : > { %v1621_v37 = vsel %vm1605_vm11, %v1602_v11, %v1604_v59 }
 0x454   : > { %v1973_v56 = vpop.permute.xlu1 %1972  ;;  %v1653_v46 = vadd.f32 %v1621_v37, %v1443_v50 }
 0x456   : > { %v1971_v13 = vpop.permute.xlu0 %1970 }
 0x457   : > { %v2002_v39 = vsel %vm1992_vm13, %v1971_v13, %v1973_v56 }
 0x458   : > { %v1979_v32 = vpop.permute.xlu1 %1978  ;;  %v2034_v49 = vadd.f32 %v2002_v39, %v1824_v17 }
 0x45a   : > { %v1977_v1 = vpop.permute.xlu0 %1976 }
 0x45b   : > { %v2004_v58 = vsel %vm1992_vm13, %v1977_v1, %v1979_v32 }
 0x45c   : > { %v2036_v53 = vadd.f32 %v2004_v58, %v1826_v2  ;;  %v1600_v20 = vpop.permute.xlu1 %1599  ;;  %v2531_v58 = vld [vmem:[%s4559_s2 + $0x10] sm:$0xff]  }
 0x45d   : > { %v1620_v9 = vsel %vm1605_vm11, %v1600_v20, %v1602_v11  ;;  %v2533_v20 = vld [vmem:[%s4559_s2 + $0x18] sm:$0xff]  }
 0x45e   : > { %v1594_v24 = vpop.permute.xlu0 %1593  ;;  %v2054_v15 = vpack.c.bf16 %v2036_v53, %v2034_v49  ;;  %v1652_v0 = vadd.f32 %v1620_v9, %v1442_v4  ;;  %v4847_v49 = vmov 0   ;;  %v2532_v53 = vld [vmem:[%s4559_s2 + $0x8] sm:$0xff]  }
 0x45f   : > { %v1618_v52 = vsel %vm1605_vm11, %v1594_v24, %v1596_v57 }
 0x460   : > { %v1975_v55 = vpop.permute.xlu1 %1974  ;;  %2142 = vmatprep.subr.bf16.mxu0 %v2054_v15  ;;  %2421 = vmatprep.subr.bf16.mxu1 %v2054_v15 }
 0x461   : > { %v2003_v3 = vsel %vm1992_vm13, %v1975_v55, %v1977_v1  ;;  %v2530_v1 = vld [vmem:[%s4559_s2] sm:$0xff]  }
 0x462   : > { %v1969_v21 = vpop.permute.xlu0 %1968  ;;  %v2035_v23 = vadd.f32 %v2003_v3, %v1825_v33 }
 0x463   : > { %v2001_v26 = vsel %vm1992_vm13, %v1969_v21, %v1971_v13  ;;  %v1650_v13 = vadd.f32 %v1618_v52, %v1440_v34 }
 0x464   : > { %v2033_v8 = vadd.f32 %v2001_v26, %v1823_v6  ;;  %v1775_v42 = vpop.permute.xlu1 %1774 }
 0x466   : > { %v1773_v7 = vpop.permute.xlu0 %1772  ;;  %v2053_v12 = vpack.c.bf16 %v2035_v23, %v2033_v8 }
 0x467   : > { %v1796_v28 = vsel %vm1782_vm12, %v1773_v7, %v1775_v42 }
 0x468   : > { %v1781_v43 = vpop.permute.xlu1 %1780  ;;  %2143 = vmatpush1.bf16.msra.mxu0 %v2053_v12  ;;  %2425 = vmatpush1.bf16.msra.mxu1 %v2053_v12  ;;  %v1828_v54 = vadd.f32 %v1796_v28, %v1651_v47 }
 0x46a   : > { %v1779_v41 = vpop.permute.xlu0 %1778 }
 0x46b   : > { %v1798_v5 = vsel %vm1782_vm12, %v1779_v41, %v1781_v43 }
 0x46c   : > { %v1777_v31 = vpop.permute.xlu1 %1776  ;;  %v1830_v59 = vadd.f32 %v1798_v5, %v1653_v46 }
 0x46d   : > { %v1797_v29 = vsel %vm1782_vm12, %v1777_v31, %v1779_v41 }
 0x46e   : > { %v1771_v30 = vpop.permute.xlu0 %1770  ;;  %v1829_v14 = vadd.f32 %v1797_v29, %v1652_v0 }
 0x46f   : > { %v1795_v56 = vsel %vm1782_vm12, %v1771_v30, %v1773_v7 }
 0x470   : > { %v1985_v44 = vpop.permute.xlu1 %1984  ;;  %v1827_v51 = vadd.f32 %v1795_v56, %v1650_v13 }
 0x472   : > { %v1983_v36 = vpop.permute.xlu0 %1982 }
 0x473   : > { %v2006_v18 = vsel %vm1992_vm13, %v1983_v36, %v1985_v44 }
 0x474   : > { %v1991_v27 = vpop.permute.xlu1 %1990  ;;  %v2038_v11 = vadd.f32 %v2006_v18, %v1828_v54 }
 0x476   : > { %v1989_v61 = vpop.permute.xlu0 %1988 }
 0x477   : > { %v2008_v40 = vsel %vm1992_vm13, %v1989_v61, %v1991_v27 }
 0x478   : > { %v2040_v48 = vadd.f32 %v2008_v40, %v1830_v59  ;;  %v1987_v57 = vpop.permute.xlu1 %1986 }
 0x479   : > { %v2007_v22 = vsel %vm1992_vm13, %v1987_v57, %v1989_v61 }
 0x47a   : > { %v1981_v35 = vpop.permute.xlu0 %1980  ;;  %v2056_v60 = vpack.c.bf16 %v2040_v48, %v2038_v11  ;;  %v2039_v39 = vadd.f32 %v2007_v22, %v1829_v14 }
 0x47b   : > { %v2005_v32 = vsel %vm1992_vm13, %v1981_v35, %v1983_v36 }
 0x47c   : > { %v2037_v17 = vadd.f32 %v2005_v32, %v1827_v51  ;;  %2144 = vmatprep.subr.bf16.mxu0 %v2056_v60  ;;  %2422 = vmatprep.subr.bf16.mxu1 %v2056_v60 }
 0x47e   : > { %v2055_v2 = vpack.c.bf16 %v2039_v39, %v2037_v17 }
 0x480   : > { %2145 = vmatpush1.bf16.msra.mxu0 %v2055_v2  ;;  %2426 = vmatpush1.bf16.msra.mxu1 %v2055_v2 }
 0x483   : > { %2408 = vmatmul.mubr.msk.bf16.vlgmr.msra.gmra.mrb[0].mxu0 %vm2125_vm14, %v2530_v1  ;;  %2410 = vmatmul.mubr.msk.bf16.vlgmr.msra.gmra.mrb[0].mxu1 %vm2125_vm14, %v2531_v58 }
 0x484   : > { %2180 = vmatprep.mubr.bf16.mxu0 %v4847_v49  ;;  %2200 = vmatprep.mubr.bf16.mxu1 %v4847_v49 }
 0x489   : > { %v2073_v15 = vpop.permute.xlu1 %2072 }
 0x48b   : > { %2409 = vmatmul.mubr.msk.bf16.gmra.mrb[4].mxu0 %vm2125_vm14, %v2532_v53  ;;  %2411 = vmatmul.mubr.msk.bf16.gmra.mrb[4].mxu1 %vm2125_vm14, %v2533_v20  ;;  %v2068_v24 = vpop.permute.xlu0 %2067 }
 0x48d   : > { %v4479_v38 = vpop.permute.xlu1 %2077 }
 0x48f   : > { %v4477_v45 = vpop.permute.xlu0 %2082 }
 0x491   : > { %v2088_v3 = vpop.permute.xlu1 %2087 }
 0x493   : > { %v2093_v55 = vpop.permute.xlu0 %2092 }
 0x495   : > { %v2098_v53 = vpop.permute.xlu1 %2097 }
 0x556   : > { %v2172_v33 = vpop.f32.mrb[0].mxu0  ;;  %v2192_v6 = vpop.f32.mrb[0].mxu1 }
 0x557   : > { %v2173_v21 = vadd.f32 %v2172_v33, %v2068_v24  ;;  %v2193_v26 = vadd.f32 %v2192_v6, %v2088_v3  ;;  %v2174_v23 = vpop.f32.mrb[1].mxu0  ;;  %v2194_v8 = vpop.f32.mrb[1].mxu1 }
 0x558   : > { %v2175_v42 = vadd.f32 %v2174_v23, %v2068_v24  ;;  %v2195_v7 = vadd.f32 %v2194_v8, %v2088_v3  ;;  %v2176_v12 = vpop.f32.mrb[2].mxu0  ;;  %v2196_v43 = vpop.f32.mrb[2].mxu1 }
 0x559   : > { %v2211_v41 = vadd.f32 3.0, %v2173_v21  ;;  %v2219_v31 = vadd.f32 3.0, %v2193_v26  ;;  %v2177_v30 = vadd.f32 %v2176_v12, %v2073_v15  ;;  %v2197_v19 = vadd.f32 %v2196_v43, %v2093_v55  ;;  %v2178_v25 = vpop.f32.mrb[3].mxu0  ;;  %v2198_v44 = vpop.f32.mrb[3].mxu1 }
 0x55a   : > { %v2212_v63 = vadd.f32 3.0, %v2175_v42  ;;  %v2220_v37 = vadd.f32 3.0, %v2195_v7  ;;  %v2179_v16 = vadd.f32 %v2178_v25, %v2073_v15  ;;  %v2199_v50 = vadd.f32 %v2198_v44, %v2093_v55 }
 0x55b   : > { %v2227_v36 = vmax.f32 %v2211_v41, 0.0  ;;  %v2235_v62 = vmax.f32 %v2219_v31, 0.0  ;;  %v2213_v10 = vadd.f32 3.0, %v2177_v30  ;;  %v2221_v28 = vadd.f32 3.0, %v2197_v19 }
 0x55c   : > { %v2228_v5 = vmax.f32 %v2212_v63, 0.0  ;;  %v2236_v47 = vmax.f32 %v2220_v37, 0.0  ;;  %v2214_v46 = vadd.f32 3.0, %v2179_v16  ;;  %v2222_v27 = vadd.f32 3.0, %v2199_v50 }
 0x55d   : > { %v2243_v9 = vmin.f32 %v2227_v36, 6.0  ;;  %v2251_v52 = vmin.f32 %v2235_v62, 6.0  ;;  %v2229_v18 = vmax.f32 %v2213_v10, 0.0  ;;  %v2237_v4 = vmax.f32 %v2221_v28, 0.0 }
 0x55e   : > { %v2244_v34 = vmin.f32 %v2228_v5, 6.0  ;;  %v2252_v54 = vmin.f32 %v2236_v47, 6.0  ;;  %v2230_v59 = vmax.f32 %v2214_v46, 0.0  ;;  %v2238_v61 = vmax.f32 %v2222_v27, 0.0  ;;  %v2182_v29 = vpop.f32.mrb[4].mxu0  ;;  %v2202_v56 = vpop.f32.mrb[4].mxu1 }
 0x55f   : > { %v2259_v40 = vmul.f32 %v2243_v9, %v2173_v21  ;;  %v2267_v0 = vmul.f32 %v2251_v52, %v2193_v26  ;;  %v2245_v13 = vmin.f32 %v2229_v18, 6.0  ;;  %v2253_v11 = vmin.f32 %v2237_v4, 6.0  ;;  %v2184_v48 = vpop.f32.mrb[5].mxu0  ;;  %v2204_v57 = vpop.f32.mrb[5].mxu1 }
 0x560   : > { %v2260_v22 = vmul.f32 %v2244_v34, %v2175_v42  ;;  %v2268_v14 = vmul.f32 %v2252_v54, %v2195_v7  ;;  %v2246_v51 = vmin.f32 %v2230_v59, 6.0  ;;  %v2254_v35 = vmin.f32 %v2238_v61, 6.0  ;;  %v2186_v60 = vpop.f32.mrb[6].mxu0  ;;  %v2206_v32 = vpop.f32.mrb[6].mxu1 }
 0x561   : > { %v2275_v39 = vmul.f32 0.16666667, %v2259_v40  ;;  %v2283_v17 = vmul.f32 0.16666667, %v2267_v0  ;;  %v2261_v2 = vmul.f32 %v2245_v13, %v2177_v30  ;;  %v2269_v1 = vmul.f32 %v2253_v11, %v2197_v19  ;;  %v2188_v58 = vpop.f32.mrb[7].mxu0  ;;  %v2208_v49 = vpop.f32.mrb[7].mxu1 }
 0x562   : > { %v2276_v20 = vmul.f32 0.16666667, %v2260_v22  ;;  %v2284_v24 = vmul.f32 0.16666667, %v2268_v14  ;;  %v2262_v15 = vmul.f32 %v2246_v51, %v2179_v16  ;;  %v2270_v55 = vmul.f32 %v2254_v35, %v2199_v50  ;;  %v2103_v26 = vpop.permute.xlu0 %2102 }
 0x563   : > { %2291 = vst [vmem:[%s4483_s10] sm:$0xff] %v2275_v39  ;;  %2299 = vst [vmem:[%s4483_s10 + $0x40] sm:$0xff] %v2283_v17  ;;  %v2277_v3 = vmul.f32 0.16666667, %v2261_v2  ;;  %v2285_v33 = vmul.f32 0.16666667, %v2269_v1  ;;  %v2183_v6 = vadd.f32 %v2182_v29, %v4479_v38  ;;  %v2203_v21 = vadd.f32 %v2202_v56, %v2098_v53 }
 0x564   : > { %2292 = vst [vmem:[%s4483_s10 + $0x8] sm:$0xff] %v2276_v20  ;;  %2300 = vst [vmem:[%s4483_s10 + $0x48] sm:$0xff] %v2284_v24  ;;  %v2278_v23 = vmul.f32 0.16666667, %v2262_v15  ;;  %v2286_v8 = vmul.f32 0.16666667, %v2270_v55  ;;  %v2185_v42 = vadd.f32 %v2184_v48, %v4479_v38  ;;  %v2205_v7 = vadd.f32 %v2204_v57, %v2098_v53 }
 0x565   : > { %2293 = vst [vmem:[%s4483_s10 + $0x10] sm:$0xff] %v2277_v3  ;;  %2301 = vst [vmem:[%s4483_s10 + $0x50] sm:$0xff] %v2285_v33  ;;  %v2215_v12 = vadd.f32 3.0, %v2183_v6  ;;  %v2223_v43 = vadd.f32 3.0, %v2203_v21  ;;  %v2187_v41 = vadd.f32 %v2186_v60, %v4477_v45  ;;  %v2207_v31 = vadd.f32 %v2206_v32, %v2103_v26 }
 0x566   : > { %2294 = vst [vmem:[%s4483_s10 + $0x18] sm:$0xff] %v2278_v23  ;;  %2302 = vst [vmem:[%s4483_s10 + $0x58] sm:$0xff] %v2286_v8  ;;  %v2216_v30 = vadd.f32 3.0, %v2185_v42  ;;  %v2224_v19 = vadd.f32 3.0, %v2205_v7  ;;  %v2189_v25 = vadd.f32 %v2188_v58, %v4477_v45  ;;  %v2209_v44 = vadd.f32 %v2208_v49, %v2103_v26 }
 0x567   : > { %v2231_v63 = vmax.f32 %v2215_v12, 0.0  ;;  %v2239_v37 = vmax.f32 %v2223_v43, 0.0  ;;  %v2217_v16 = vadd.f32 3.0, %v2187_v41  ;;  %v2225_v50 = vadd.f32 3.0, %v2207_v31 }
 0x568   : > { %v2232_v38 = vmax.f32 %v2216_v30, 0.0  ;;  %v2240_v36 = vmax.f32 %v2224_v19, 0.0  ;;  %v2218_v62 = vadd.f32 3.0, %v2189_v25  ;;  %v2226_v10 = vadd.f32 3.0, %v2209_v44 }
 0x569   : > { %v2247_v28 = vmin.f32 %v2231_v63, 6.0  ;;  %v2255_v5 = vmin.f32 %v2239_v37, 6.0  ;;  %v2233_v47 = vmax.f32 %v2217_v16, 0.0  ;;  %v2241_v46 = vmax.f32 %v2225_v50, 0.0 }
 0x56a   : > { %v2248_v27 = vmin.f32 %v2232_v38, 6.0  ;;  %v2256_v9 = vmin.f32 %v2240_v36, 6.0  ;;  %v2234_v52 = vmax.f32 %v2218_v62, 0.0  ;;  %v2242_v18 = vmax.f32 %v2226_v10, 0.0 }
 0x56b   : > { %v2263_v45 = vmul.f32 %v2247_v28, %v2183_v6  ;;  %v2271_v4 = vmul.f32 %v2255_v5, %v2203_v21  ;;  %v2249_v34 = vmin.f32 %v2233_v47, 6.0  ;;  %v2257_v54 = vmin.f32 %v2241_v46, 6.0 }
 0x56c   : > { %v2264_v59 = vmul.f32 %v2248_v27, %v2185_v42  ;;  %v2272_v61 = vmul.f32 %v2256_v9, %v2205_v7  ;;  %v2250_v29 = vmin.f32 %v2234_v52, 6.0  ;;  %v2258_v56 = vmin.f32 %v2242_v18, 6.0 }
 0x56d   : > { %v2279_v40 = vmul.f32 0.16666667, %v2263_v45  ;;  %v2287_v0 = vmul.f32 0.16666667, %v2271_v4  ;;  %v2265_v13 = vmul.f32 %v2249_v34, %v2187_v41  ;;  %v2273_v11 = vmul.f32 %v2257_v54, %v2207_v31 }
 0x56e   : > { %v2280_v48 = vmul.f32 0.16666667, %v2264_v59  ;;  %v2288_v57 = vmul.f32 0.16666667, %v2272_v61  ;;  %v2266_v22 = vmul.f32 %v2250_v29, %v2189_v25  ;;  %v2274_v14 = vmul.f32 %v2258_v56, %v2209_v44 }
 0x56f   : > { %2295 = vst [vmem:[%s4483_s10 + $0x20] sm:$0xff] %v2279_v40  ;;  %2303 = vst [vmem:[%s4483_s10 + $0x60] sm:$0xff] %v2287_v0  ;;  %v2281_v51 = vmul.f32 0.16666667, %v2265_v13  ;;  %v2289_v35 = vmul.f32 0.16666667, %v2273_v11 }
 0x570   : > { %2296 = vst [vmem:[%s4483_s10 + $0x28] sm:$0xff] %v2280_v48  ;;  %2304 = vst [vmem:[%s4483_s10 + $0x68] sm:$0xff] %v2288_v57  ;;  %v2282_v60 = vmul.f32 0.16666667, %v2266_v22  ;;  %v2290_v32 = vmul.f32 0.16666667, %v2274_v14 }
 0x571   : > { %2297 = vst [vmem:[%s4483_s10 + $0x30] sm:$0xff] %v2281_v51  ;;  %2305 = vst [vmem:[%s4483_s10 + $0x70] sm:$0xff] %v2289_v35 }
 0x572   : > { %2298 = vst [vmem:[%s4483_s10 + $0x38] sm:$0xff] %v2282_v60  ;;  %2306 = vst [vmem:[%s4483_s10 + $0x78] sm:$0xff] %v2290_v32 }
 0x573   : > { %2585 = shalt.err (!%p2582_p2)
}
 0x574   : > { %s2586_s8 = scalar_lea.hbm %s4504_s17, 2048  ;;  %s2590_s9 = scalar_lea.hbm %s4562_s5, 4096 }
 0x575   : > { %p2587_p4 = scmp.ne.s32.totalorder %s4504_s17, %s2586_s8  ;;  %p2591_p9 = scmp.lt.u32.totalorder %s4504_s17, %s4562_s5 }
 0x576   : > { %p2592_p1 = scmp.lt.u32.totalorder %s2590_s9, %s2586_s8  ;;  %p2594_p6 = scmp.lt.u32.totalorder %s2586_s8, %s4504_s17 }
 0x577   : > { %p2588_p5 = pnand %p2587_p4, %p4848_p11 }
 0x578   : > { %p2593_p3 = por %p2592_p1, %p2591_p9 }
 0x579   : > { %p2589_p7 = pneg %p2588_p5 }
 0x57a   : > { %p2595_p12 = por %p2594_p6, %p2593_p3 }
 0x57c   : > { %p2596_p13 = pnand %p2595_p12, %p2589_p7 }
 0x57e   : > { %2599 = shalt.err (!%p2596_p13)
}
 0x57f   : > { %s2667_s22 = smov 256  }
 0x580   : > { %2429 = dma.vmem_to_hbm [thread:$0]  (%p4848_p11), %s4508_s11, 2048, %s4504_s17, %s2308_s28, %s2667_s22, %s2667_s22, %s2651_s13  }
 0x581 PF: > { %s2336_s26 = sand.u32 1, %s2626_s18   ;;  %p4849_p8 = scmp.ne.s32.totalorder %s4638_s6, 0 }
 0x582   : > { %p4850_p10 = scmp.ge.s32.totalorder %s2638_s21, 2  ;;  %s2337_s29 = scalar_lea.sflag [#allocation4], %s2336_s26 }
 0x584   : > { %p2436_p0 = pnand %p4850_p10, %p4849_p8 }
 0x586   : > { %2621 = dma.done.wait (!%p2436_p0), %s2337_s29, 2048  }
 0x587   : > { %2623 = vsyncadd (!%p2436_p0), %s2337_s29, 4294965248  ;;  %p18_p2 = scmp.ge.s32.totalorder %s2723_s24, 4   ;;  %s4851_s18 = smov %s2630_s19 }
 0x588   : > { %s4852_s19 = smov %s2634_s20  ;;  %s4853_s20 = smov %s2735_s27 }
 0x589   : > { %s4854_s21 = smov %s2723_s24  ;;  %20 = sbr.rel (!%p18_p2) target bundleno = 5 (0x5), region = 86 }
 0x590   :  { %2342 = vsyncpa [#allocation3], 1 }
 0x591   :  { %2344 = vsyncpa [#allocation3 + $0x1], 1 }
 0x592   :  { %2345 = vsyncpa [#allocation4], 1 }
 0x593   :  { %2347 = vsyncpa [#allocation4 + $0x1], 1 }

</bundles_post_ra>
